<compile_context>
chip_gen: v5e
topology: v5e:2x2
jax: 0.10.0
libtpu: 0.0.40
codegen_flags: <defaults>
</compile_context>

<pallas_src>
import numpy as np
import jax
import jax.numpy as jnp
from jax.experimental import pallas as pl
from jax.experimental.pallas import tpu as pltpu


# ----------------------------- host-side parameter-matrix setup -----------------------

def _round_up(x: int, m: int) -> int:
    return (x + m - 1) // m * m


def _interp_matrix(in_size: int, out_size: int) -> np.ndarray:
    """PyTorch trilinear (align_corners=False) 1-D interpolation matrix (out, in)."""
    scale = in_size / out_size
    m = np.zeros((out_size, in_size), dtype=np.float32)
    for o in range(out_size):
        src = max((o + 0.5) * scale - 0.5, 0.0)
        i0 = min(int(np.floor(src)), in_size - 1)
        lam = src - i0
        i1 = min(i0 + 1, in_size - 1)
        m[o, i0] += 1.0 - lam
        m[o, i1] += lam
    return m


def _interp_matrix_padded(in_size: int, out_size: int) -> np.ndarray:
    """Same, plus one zero row on each side (bakes the conv 'same' zero padding in)."""
    return np.pad(_interp_matrix(in_size, out_size), ((1, 1), (0, 0)))


def _fused_conv_taps(weight: np.ndarray, Wo: int, wpc_pad: int, nout_pad: int) -> np.ndarray:
    """Fused conv matrix for the im2col LHS: rows (kd*3+kh, wp, ci) with each (kd,kh) block
    zero-padded to wpc_pad; cols (w, co) zero-padded to nout_pad.  Each block is the W-only
    Toeplitz tap (sums over kw and ci)."""
    Cout, Cin, KD, KH, KW = weight.shape
    taps = np.zeros((KD * KH, wpc_pad, nout_pad), dtype=np.float32)
    for kd in range(KD):
        for kh in range(KH):
            t = taps[kd * KH + kh]
            for kw in range(KW):
                w_t = weight[:, :, kd, kh, kw].T          # (Cin, Cout)
                for w in range(Wo):
                    r0 = (w + kw) * Cin
                    c0 = w * Cout
                    t[r0:r0 + Cin, c0:c0 + Cout] += w_t
    return taps.reshape(KD * KH * wpc_pad, nout_pad)


def _vmem_capacity_bytes() -> int:
    """Physical per-core VMEM for a generation-aware vmem_limit (64 MiB v7x, 128 MiB v5e/v6e).
    Narrow guard only around the hardware-info query; it cannot mask kernel errors."""
    try:
        return int(pltpu.get_tpu_info().vmem_capacity_bytes)
    except Exception:
        return 64 * 1024 * 1024          # conservative (v7x-safe) default


# ----------------------------------- wrapper + kernel ---------------------------------

def upsample_block_forward(x, weight, bias, scale_factor: int):
    """x: (N, Cin, D, H, W) f32; weight: (Cout, Cin, 3, 3, 3); bias: (Cout,).
    Returns (N, Cout, D*s, H*s, W*s) f32 = Conv3d(k=3,'same')(Upsample(trilinear, s)(x))."""
    N, Cin, Di, Hi, Wi = x.shape
    Cout = weight.shape[0]
    s = scale_factor
    Do, Ho, Wo = Di * s, Hi * s, Wi * s
    Dp, Hp, Wp = Do + 2, Ho + 2, Wo + 2            # conv 'same' zero-padded extents
    DIHI, DPHP = Di * Hi, Dp * Hp

    # ---- batch tile: keep G = N // NB >= 2 (DMA/compute overlap + v7x megacore), and within
    # that pick the smallest NB whose conv-matmul M (NB*DPHP rows, ~mult of 128/256 preferred)
    # reaches one MXU pass.
    if N == 1:
        NB = 1          # TODO(synk): a single sample cannot feed both v7x TensorCores
    else:
        allowed = [c for c in range(1, N + 1) if N % c == 0 and N // c >= 2]
        NB = allowed[-1]
        for c in allowed:
            if c * DPHP >= 256:
                NB = c
                break
    G = N // NB

    ROW_STRIDE = _round_up(DPHP, 8)                # per-batch-element row stride in the tile
    M_OUT = NB * ROW_STRIDE                        # conv matmul M / output block rows
    MAX_OFF = 2 * Hp + 2                           # largest (kd,kh) row shift
    UR = _round_up(M_OUT + MAX_OFF, 8)             # u scratch rows (shifted reads in bounds)

    # Kept output rows (d < Do, h < Ho) only ever read u rows written by the interp; all
    # shifted reads stay inside the u scratch.
    assert (Do - 1) * Hp + (Ho - 1) + MAX_OFF < DPHP
    assert M_OUT + MAX_OFF <= UR

    # ---- lane widths: input keeps its natural width (full-dim block); hot output / K columns
    # are zero-padded to multiples of 128 so loads/stores stay lane-dense.
    WIC = Wi * Cin                                 # input row width (unpadded)
    WPC = Wp * Cin
    NOUTR = Wo * Cout
    WPC_P = _round_up(WPC, 128)
    NOUT_P = _round_up(NOUTR, 128)
    KCONV = 9 * WPC_P                              # fused conv matmul K

    w_np = np.asarray(weight, dtype=np.float32)
    b_np = np.asarray(bias, dtype=np.float32)

    # ---- parameter matrices (host preprocessing); bf16 operands, f32 MXU accumulation.
    mdp = _interp_matrix_padded(Di, Do)            # (Dp, Di)
    mhp = _interp_matrix_padded(Hi, Ho)            # (Hp, Hi)
    mwp = _interp_matrix_padded(Wi, Wo)            # (Wp, Wi)

    mdh = np.kron(mdp, mhp)                        # (DPHP, DIHI): D+H interp (+ conv pad)
    kwm = np.zeros((WIC, WPC_P), dtype=np.float32)  # W interp (+ conv pad) (x) I_Cin
    kwm[:, :WPC] = np.kron(mwp.T, np.eye(Cin, dtype=np.float32))
    taps = _fused_conv_taps(w_np, Wo, WPC_P, NOUT_P)   # (9*WPC_P, NOUT_P)
    brow = np.zeros((1, NOUT_P), dtype=np.float32)
    brow[0, :NOUTR] = np.tile(b_np, Wo)

    mdh_j = jnp.asarray(mdh, dtype=jnp.bfloat16)
    kwm_j = jnp.asarray(kwm, dtype=jnp.bfloat16)
    taps_j = jnp.asarray(taps, dtype=jnp.bfloat16)
    brow_j = jnp.asarray(brow, dtype=jnp.float32)

    # ---- input: NCDHW -> rows (n, di, hi), cols (wi, ci); no host-side lane padding.
    x_cl = jnp.transpose(x, (0, 2, 3, 4, 1)).reshape(N, DIHI, WIC)
    x_in = x_cl.reshape(G, NB * DIHI, WIC).astype(jnp.bfloat16)

    def kernel(x_ref, kw_ref, mdh_ref, tap_ref, b_ref, o_ref, u_ref, l_ref):
        # Zero only the pad strips of u (gap rows between batch elements + tail rows).
        # In-range rows are fully overwritten below; pad *columns* are already zero because
        # kwm's pad columns are zero (and the taps' pad rows are zero regardless).
        for n in range(NB):
            lo = n * ROW_STRIDE + DPHP
            hi = (n + 1) * ROW_STRIDE if n + 1 < NB else UR
            if hi > lo:
                u_ref[lo:hi, :] = jnp.zeros((hi - lo, WPC_P), jnp.bfloat16)

        # (1) W interp + W 'same' pad, hoisted over the whole batch tile: M = NB*Di*Hi.
        xw = jnp.dot(x_ref[...], kw_ref[...],
                     preferred_element_type=jnp.float32).astype(jnp.bfloat16)

        # (2) D+H interp + 'same' pad per batch element (left matrix shared, M = Dp*Hp).
        for n in range(NB):
            un = jnp.dot(mdh_ref[...], xw[n * DIHI:(n + 1) * DIHI, :],
                         preferred_element_type=jnp.float32)
            u_ref[n * ROW_STRIDE:n * ROW_STRIDE + DPHP, :] = un.astype(jnp.bfloat16)

        # (3) im2col over (kd, kh): nine lane-aligned column blocks, each a constant row shift
        #     of u.  The misaligned row offset (kd*Hp+kh) only appears inside this VPU gather;
        #     the MXU operand below is fully aligned.
        for kd in range(3):
            for kh in range(3):
                j = kd * 3 + kh
                off = kd * Hp + kh
                l_ref[:, j * WPC_P:(j + 1) * WPC_P] = u_ref[off:off + M_OUT, :]

        # (4) the whole 3x3x3 conv as ONE matmul (K = 9*WPC_P), bias added once.
        o_ref[...] = (jnp.dot(l_ref[...], tap_ref[...],
                              preferred_element_type=jnp.float32)
                      + b_ref[...]).astype(o_ref.dtype)

    # ---- cost / VMEM bookkeeping
    flops = 2 * G * (NB * DIHI * WIC * WPC_P          # W interp
                     + NB * DPHP * DIHI * WPC_P       # D+H interp
                     + M_OUT * KCONV * NOUT_P)        # fused conv matmul
    bytes_accessed = (x_in.size * 2 + kwm_j.size * 2 + mdh_j.size * 2 + taps_j.size * 2
                      + brow_j.size * 4 + G * M_OUT * NOUT_P * 4)

    blk_bytes = (NB * DIHI * WIC * 2                  # x block
                 + M_OUT * NOUT_P * 4                 # out block
                 + WIC * WPC_P * 2 + DPHP * DIHI * 2  # kwm, mdh
                 + KCONV * NOUT_P * 2                 # fused taps
                 + NOUT_P * 4)                        # bias row
    scratch_bytes = UR * WPC_P * 2 + M_OUT * KCONV * 2
    vmem_need = 2 * blk_bytes + scratch_bytes         # pipelined operands double-buffered
    vmem_limit = min(int(_vmem_capacity_bytes() * 0.75),
                     max(32 * 1024 * 1024, 2 * vmem_need + (8 << 20)))

    out_flat = pl.pallas_call(
        kernel,
        out_shape=jax.ShapeDtypeStruct((G, M_OUT, NOUT_P), jnp.float32),
        grid=(G,),
        in_specs=[
            pl.BlockSpec((None, NB * DIHI, WIC), lambda g: (g, 0, 0)),   # x (per grid step)
            pl.BlockSpec((WIC, WPC_P), lambda g: (0, 0)),                # W interp (grid-inv.)
            pl.BlockSpec((DPHP, DIHI), lambda g: (0, 0)),                # D+H interp
            pl.BlockSpec((KCONV, NOUT_P), lambda g: (0, 0)),             # fused conv taps
            pl.BlockSpec((1, NOUT_P), lambda g: (0, 0)),                 # bias row
        ],
        out_specs=pl.BlockSpec((None, M_OUT, NOUT_P), lambda g: (g, 0, 0)),
        scratch_shapes=[pltpu.VMEM((UR, WPC_P), jnp.bfloat16),           # padded upsampled vol
                        pltpu.VMEM((M_OUT, KCONV), jnp.bfloat16)],       # im2col LHS
        compiler_params=pltpu.CompilerParams(
            dimension_semantics=("parallel",),
            vmem_limit_bytes=vmem_limit),
        cost_estimate=pl.CostEstimate(flops=flops, transcendentals=0,
                                      bytes_accessed=bytes_accessed),
    )(x_in, kwm_j, mdh_j, taps_j, brow_j)

    # ---- unpack: (G, NB*ROW_STRIDE, NOUT_P) -> (N, Cout, Do, Ho, Wo); junk pad rows / lane
    # pad columns are sliced away here.
    out = out_flat.reshape(G, NB, ROW_STRIDE, NOUT_P)[:, :, :DPHP, :]
    out = out.reshape(G, NB, Dp, Hp, NOUT_P)[:, :, :Do, :Ho, :NOUTR]
    out = out.reshape(N, Do, Ho, Wo, Cout)
    return jnp.transpose(out, (0, 4, 1, 2, 3))


# ----------------------------------- reference (pure JAX) -----------------------------

def upsample_block_reference(x, weight, bias, scale_factor: int):
    N, Cin, Di, Hi, Wi = x.shape
    s = scale_factor
    md = jnp.asarray(_interp_matrix(Di, Di * s))
    mh = jnp.asarray(_interp_matrix(Hi, Hi * s))
    mw = jnp.asarray(_interp_matrix(Wi, Wi * s))
    up = jnp.einsum('od,ncdhw->ncohw', md, x)
    up = jnp.einsum('ph,ncdhw->ncdpw', mh, up)
    up = jnp.einsum('qw,ncdhw->ncdhq', mw, up)
    out = jax.lax.conv_general_dilated(
        up, weight, window_strides=(1, 1, 1), padding='SAME',
        dimension_numbers=('NCDHW', 'OIDHW', 'NCDHW'))
    return out + bias[None, :, None, None, None]


# ----------------------------------- main ---------------------------------------------

if __name__ == "__main__":
    N, Cin, Cout, D, H, W, scale = 2, 4, 8, 4, 4, 4, 2

    key = jax.random.PRNGKey(0)
    kx, kwkey = jax.random.split(key)
    x = jax.random.normal(kx, (N, Cin, D, H, W), dtype=jnp.float32)

    # Deterministic synthetic init matching the module's __init__:
    # kaiming_normal_ (fan_in = Cin * 3^3, gain = sqrt(2)), bias zeroed.
    fan_in = Cin * 3 * 3 * 3
    std = float(np.sqrt(2.0 / fan_in))
    weight = jax.random.normal(kwkey, (Cout, Cin, 3, 3, 3), dtype=jnp.float32) * std
    bias = jnp.zeros((Cout,), dtype=jnp.float32)

    out = jax.block_until_ready(upsample_block_forward(x, weight, bias, scale))
    ref = jax.block_until_ready(upsample_block_reference(x, weight, bias, scale))

    # Precision note: bf16 operands (incl. quantized interp/tap matrices) with f32 MXU
    # accumulation bound accuracy to ~1e-2; the 2e-2 tolerance is that intentional choice.
    np.testing.assert_allclose(np.asarray(out), np.asarray(ref), rtol=2e-2, atol=2e-2)
    assert out.shape == (N, Cout, D * scale, H * scale, W * scale)

    print("KERNEL_OK")
</pallas_src>

<mosaic_0001>
module attributes {stable_mosaic.version = 11 : i64} {
  func.func @kernel(%arg0: i32, %arg1: memref<1x16x16xbf16, #tpu.memory_space<vmem>>, %arg2: memref<16x128xbf16, #tpu.memory_space<vmem>>, %arg3: memref<100x16xbf16, #tpu.memory_space<vmem>>, %arg4: memref<1152x128xbf16, #tpu.memory_space<vmem>>, %arg5: memref<1x128xf32, #tpu.memory_space<vmem>>, %arg6: memref<1x104x128xf32, #tpu.memory_space<vmem>>, %arg7: memref<128x128xbf16, #tpu.memory_space<vmem>>, %arg8: memref<104x1152xbf16, #tpu.memory_space<vmem>>) attributes {dimension_semantics = [#tpu.dimension_semantics<parallel>], iteration_bounds = array<i64: 2>, scalar_prefetch = 0 : i64, scratch_operands = 2 : i64, tpu.core_type = #tpu.core_type<tc>, window_params = [{transform_indices = @transform_0, window_bounds = array<i64: 1, 16, 16>}, {pipeline_mode = #tpu.pipeline_mode<synchronous>, transform_indices = @transform_1, window_bounds = array<i64: 16, 128>}, {pipeline_mode = #tpu.pipeline_mode<synchronous>, transform_indices = @transform_2, window_bounds = array<i64: 100, 16>}, {pipeline_mode = #tpu.pipeline_mode<synchronous>, transform_indices = @transform_3, window_bounds = array<i64: 1152, 128>}, {pipeline_mode = #tpu.pipeline_mode<synchronous>, transform_indices = @transform_4, window_bounds = array<i64: 1, 128>}, {transform_indices = @transform_5, window_bounds = array<i64: 1, 104, 128>}]} {
    %cst = arith.constant 0.000000e+00 : bf16
    %0 = vector.broadcast %cst : bf16 to vector<28x128xbf16>
    %c100 = arith.constant 100 : index
    %c0 = arith.constant 0 : index
    %1 = vector.load %arg7[%c100, %c0] : memref<128x128xbf16, #tpu.memory_space<vmem>>, vector<28x128xbf16>
    tpu.vector_store %arg7[%c100, %c0], %0 {strides = array<i32>} : memref<128x128xbf16, #tpu.memory_space<vmem>>, vector<28x128xbf16>,
    %c0_0 = arith.constant 0 : index
    %c0_1 = arith.constant 0 : index
    %c0_2 = arith.constant 0 : index
    %2 = vector.load %arg1[%c0_0, %c0_1, %c0_2] : memref<1x16x16xbf16, #tpu.memory_space<vmem>>, vector<1x16x16xbf16>
    %3 = vector.shape_cast %2 : vector<1x16x16xbf16> to vector<16x16xbf16>
    %c0_3 = arith.constant 0 : index
    %c0_4 = arith.constant 0 : index
    %4 = vector.load %arg2[%c0_3, %c0_4] : memref<16x128xbf16, #tpu.memory_space<vmem>>, vector<16x128xbf16>
    %cst_5 = arith.constant dense<0.000000e+00> : vector<16x128xf32>
    %5 = tpu.matmul %3, %4, %cst_5 {dimension_numbers = #tpu.dot_dimension_numbers<[1], [0], [0], [1], [0, 0, 1, 1], [], []>} : vector<16x16xbf16>, vector<16x128xbf16>, vector<16x128xf32> -> vector<16x128xf32>
    %6 = arith.truncf %5 : vector<16x128xf32> to vector<16x128xbf16>
    %c0_6 = arith.constant 0 : index
    %c0_7 = arith.constant 0 : index
    %7 = vector.load %arg3[%c0_6, %c0_7] : memref<100x16xbf16, #tpu.memory_space<vmem>>, vector<100x16xbf16>
    %cst_8 = arith.constant dense<0.000000e+00> : vector<100x128xf32>
    %8 = tpu.matmul %7, %6, %cst_8 {dimension_numbers = #tpu.dot_dimension_numbers<[1], [0], [0], [1], [0, 0, 1, 1], [], []>} : vector<100x16xbf16>, vector<16x128xbf16>, vector<100x128xf32> -> vector<100x128xf32>
    %9 = arith.truncf %8 : vector<100x128xf32> to vector<100x128xbf16>
    %c0_9 = arith.constant 0 : index
    %c0_10 = arith.constant 0 : index
    %10 = vector.load %arg7[%c0_9, %c0_10] : memref<128x128xbf16, #tpu.memory_space<vmem>>, vector<100x128xbf16>
    tpu.vector_store %arg7[%c0_9, %c0_10], %9 {strides = array<i32>} : memref<128x128xbf16, #tpu.memory_space<vmem>>, vector<100x128xbf16>,
    %c0_11 = arith.constant 0 : index
    %c0_12 = arith.constant 0 : index
    %11 = vector.load %arg7[%c0_11, %c0_12] : memref<128x128xbf16, #tpu.memory_space<vmem>>, vector<104x128xbf16>
    %c0_13 = arith.constant 0 : index
    %c0_14 = arith.constant 0 : index
    %12 = vector.load %arg8[%c0_13, %c0_14] : memref<104x1152xbf16, #tpu.memory_space<vmem>>, vector<104x128xbf16>
    tpu.vector_store %arg8[%c0_13, %c0_14], %11 {strides = array<i32>} : memref<104x1152xbf16, #tpu.memory_space<vmem>>, vector<104x128xbf16>,
    %c1 = arith.constant 1 : index
    %c0_15 = arith.constant 0 : index
    %13 = vector.load %arg7[%c1, %c0_15] : memref<128x128xbf16, #tpu.memory_space<vmem>>, vector<104x128xbf16>
    %c0_16 = arith.constant 0 : index
    %c128 = arith.constant 128 : index
    %14 = vector.load %arg8[%c0_16, %c128] : memref<104x1152xbf16, #tpu.memory_space<vmem>>, vector<104x128xbf16>
    tpu.vector_store %arg8[%c0_16, %c128], %13 {strides = array<i32>} : memref<104x1152xbf16, #tpu.memory_space<vmem>>, vector<104x128xbf16>,
    %c2 = arith.constant 2 : index
    %c0_17 = arith.constant 0 : index
    %15 = vector.load %arg7[%c2, %c0_17] : memref<128x128xbf16, #tpu.memory_space<vmem>>, vector<104x128xbf16>
    %c0_18 = arith.constant 0 : index
    %c256 = arith.constant 256 : index
    %16 = vector.load %arg8[%c0_18, %c256] : memref<104x1152xbf16, #tpu.memory_space<vmem>>, vector<104x128xbf16>
    tpu.vector_store %arg8[%c0_18, %c256], %15 {strides = array<i32>} : memref<104x1152xbf16, #tpu.memory_space<vmem>>, vector<104x128xbf16>,
    %c10 = arith.constant 10 : index
    %c0_19 = arith.constant 0 : index
    %17 = vector.load %arg7[%c10, %c0_19] : memref<128x128xbf16, #tpu.memory_space<vmem>>, vector<104x128xbf16>
    %c0_20 = arith.constant 0 : index
    %c384 = arith.constant 384 : index
    %18 = vector.load %arg8[%c0_20, %c384] : memref<104x1152xbf16, #tpu.memory_space<vmem>>, vector<104x128xbf16>
    tpu.vector_store %arg8[%c0_20, %c384], %17 {strides = array<i32>} : memref<104x1152xbf16, #tpu.memory_space<vmem>>, vector<104x128xbf16>,
    %c11 = arith.constant 11 : index
    %c0_21 = arith.constant 0 : index
    %19 = vector.load %arg7[%c11, %c0_21] : memref<128x128xbf16, #tpu.memory_space<vmem>>, vector<104x128xbf16>
    %c0_22 = arith.constant 0 : index
    %c512 = arith.constant 512 : index
    %20 = vector.load %arg8[%c0_22, %c512] : memref<104x1152xbf16, #tpu.memory_space<vmem>>, vector<104x128xbf16>
    tpu.vector_store %arg8[%c0_22, %c512], %19 {strides = array<i32>} : memref<104x1152xbf16, #tpu.memory_space<vmem>>, vector<104x128xbf16>,
    %c12 = arith.constant 12 : index
    %c0_23 = arith.constant 0 : index
    %21 = vector.load %arg7[%c12, %c0_23] : memref<128x128xbf16, #tpu.memory_space<vmem>>, vector<104x128xbf16>
    %c0_24 = arith.constant 0 : index
    %c640 = arith.constant 640 : index
    %22 = vector.load %arg8[%c0_24, %c640] : memref<104x1152xbf16, #tpu.memory_space<vmem>>, vector<104x128xbf16>
    tpu.vector_store %arg8[%c0_24, %c640], %21 {strides = array<i32>} : memref<104x1152xbf16, #tpu.memory_space<vmem>>, vector<104x128xbf16>,
    %c20 = arith.constant 20 : index
    %c0_25 = arith.constant 0 : index
    %23 = vector.load %arg7[%c20, %c0_25] : memref<128x128xbf16, #tpu.memory_space<vmem>>, vector<104x128xbf16>
    %c0_26 = arith.constant 0 : index
    %c768 = arith.constant 768 : index
    %24 = vector.load %arg8[%c0_26, %c768] : memref<104x1152xbf16, #tpu.memory_space<vmem>>, vector<104x128xbf16>
    tpu.vector_store %arg8[%c0_26, %c768], %23 {strides = array<i32>} : memref<104x1152xbf16, #tpu.memory_space<vmem>>, vector<104x128xbf16>,
    %c21 = arith.constant 21 : index
    %c0_27 = arith.constant 0 : index
    %25 = vector.load %arg7[%c21, %c0_27] : memref<128x128xbf16, #tpu.memory_space<vmem>>, vector<104x128xbf16>
    %c0_28 = arith.constant 0 : index
    %c896 = arith.constant 896 : index
    %26 = vector.load %arg8[%c0_28, %c896] : memref<104x1152xbf16, #tpu.memory_space<vmem>>, vector<104x128xbf16>
    tpu.vector_store %arg8[%c0_28, %c896], %25 {strides = array<i32>} : memref<104x1152xbf16, #tpu.memory_space<vmem>>, vector<104x128xbf16>,
    %c22 = arith.constant 22 : index
    %c0_29 = arith.constant 0 : index
    %27 = vector.load %arg7[%c22, %c0_29] : memref<128x128xbf16, #tpu.memory_space<vmem>>, vector<104x128xbf16>
    %c0_30 = arith.constant 0 : index
    %c1024 = arith.constant 1024 : index
    %28 = vector.load %arg8[%c0_30, %c1024] : memref<104x1152xbf16, #tpu.memory_space<vmem>>, vector<104x128xbf16>
    tpu.vector_store %arg8[%c0_30, %c1024], %27 {strides = array<i32>} : memref<104x1152xbf16, #tpu.memory_space<vmem>>, vector<104x128xbf16>,
    %c0_31 = arith.constant 0 : index
    %c0_32 = arith.constant 0 : index
    %29 = vector.load %arg8[%c0_31, %c0_32] : memref<104x1152xbf16, #tpu.memory_space<vmem>>, vector<104x1152xbf16>
    %c0_33 = arith.constant 0 : index
    %c0_34 = arith.constant 0 : index
    %30 = vector.load %arg4[%c0_33, %c0_34] : memref<1152x128xbf16, #tpu.memory_space<vmem>>, vector<1152x128xbf16>
    %cst_35 = arith.constant dense<0.000000e+00> : vector<104x128xf32>
    %31 = tpu.matmul %29, %30, %cst_35 {dimension_numbers = #tpu.dot_dimension_numbers<[1], [0], [0], [1], [0, 0, 1, 1], [], []>} : vector<104x1152xbf16>, vector<1152x128xbf16>, vector<104x128xf32> -> vector<104x128xf32>
    %c0_36 = arith.constant 0 : index
    %c0_37 = arith.constant 0 : index
    %32 = vector.load %arg5[%c0_36, %c0_37] : memref<1x128xf32, #tpu.memory_space<vmem>>, vector<1x128xf32>
    %33 = vector.broadcast %32 : vector<1x128xf32> to vector<104x128xf32>
    %34 = arith.addf %31, %33 : vector<104x128xf32>
    %c0_38 = arith.constant 0 : index
    %c0_39 = arith.constant 0 : index
    %c0_40 = arith.constant 0 : index
    %35 = vector.load %arg6[%c0_38, %c0_39, %c0_40] : memref<1x104x128xf32, #tpu.memory_space<vmem>>, vector<1x104x128xf32>
    %36 = vector.shape_cast %35 : vector<1x104x128xf32> to vector<104x128xf32>
    %37 = vector.shape_cast %34 : vector<104x128xf32> to vector<1x104x128xf32>
    tpu.vector_store %arg6[%c0_38, %c0_39, %c0_40], %37 {strides = array<i32>} : memref<1x104x128xf32, #tpu.memory_space<vmem>>, vector<1x104x128xf32>,
    return
  }
  func.func @transform_0(%arg0: i32) -> (i32, i32, i32) {
    %c0_i32 = arith.constant 0 : i32
    %c0_i32_0 = arith.constant 0 : i32
    %c0_i32_1 = arith.constant 0 : i32
    return %arg0, %c0_i32, %c0_i32_0 : i32, i32, i32
  }
  func.func @transform_1(%arg0: i32) -> (i32, i32) {
    %c0_i32 = arith.constant 0 : i32
    %c0_i32_0 = arith.constant 0 : i32
    %c0_i32_1 = arith.constant 0 : i32
    return %c0_i32, %c0_i32_0 : i32, i32
  }
  func.func @transform_2(%arg0: i32) -> (i32, i32) {
    %c0_i32 = arith.constant 0 : i32
    %c0_i32_0 = arith.constant 0 : i32
    %c0_i32_1 = arith.constant 0 : i32
    return %c0_i32, %c0_i32_0 : i32, i32
  }
  func.func @transform_3(%arg0: i32) -> (i32, i32) {
    %c0_i32 = arith.constant 0 : i32
    %c0_i32_0 = arith.constant 0 : i32
    %c0_i32_1 = arith.constant 0 : i32
    return %c0_i32, %c0_i32_0 : i32, i32
  }
  func.func @transform_4(%arg0: i32) -> (i32, i32) {
    %c0_i32 = arith.constant 0 : i32
    %c0_i32_0 = arith.constant 0 : i32
    %c0_i32_1 = arith.constant 0 : i32
    return %c0_i32, %c0_i32_0 : i32, i32
  }
  func.func @transform_5(%arg0: i32) -> (i32, i32, i32) {
    %c0_i32 = arith.constant 0 : i32
    %c0_i32_0 = arith.constant 0 : i32
    %c0_i32_1 = arith.constant 0 : i32
    return %arg0, %c0_i32, %c0_i32_0 : i32, i32, i32
  }
}

</mosaic_0001>

<bundles_post_ra>
// kernel: tpu_custom_call.1
= control target key start
LH: loop header
LB: loop body
LE: loop exit
PB: predicated region body
PF: predicated region fallthrough
CT: control target
= control target key end

     0   :  { %10 = vsyncpa [#allocation5], 0  ;;  %s5153_s0 = inlined_call_operand.vmem [shape: bf16[2,16,16], index: 0, kind: input, shape index: {}]   ;;  %s5154_s1 = inlined_call_operand.vmem [shape: bf16[16,128], index: 1, kind: input, shape index: {}]   ;;  %s5155_s2 = inlined_call_operand.vmem [shape: bf16[100,16], index: 2, kind: input, shape index: {}]   ;;  %s5156_s3 = inlined_call_operand.hbm [shape: bf16[1152,128], index: 3, kind: input, shape index: {}]   ;;  %s5157_s4 = inlined_call_operand.vmem [shape: f32[1,128], index: 4, kind: input, shape index: {}]   ;;  %s5158_s5 = inlined_call_operand.hbm [shape: f32[2,104,128], index: 5, kind: output, shape index: {}]  }
   0x1   :  { %11 = vsyncpa [#allocation6], 0 }
   0x2   :  { %13 = vsyncpa [#allocation6 + $0x1], 0  ;;  %s3842_s18 = smov 0   ;;  %s3844_s19 = smov 0  }
   0x3   :  { %s3846_s20 = smov 0   ;;  %s3848_s21 = smov 0  }
   0x4 LB: > { %s3863_s22 = sadd.s32 4294967295, %s3804_s21   ;;  %s2902_s23 = sadd.s32 4294967294, %s3804_s21   ;;  %s3804_s21 = sphi %s3848_s21, %s5321_s21   ;;  %s3800_s20 = sphi %s3846_s20, %s5320_s20   ;;  %s3796_s19 = sphi %s3844_s19, %s5319_s19   ;;  %s3792_s18 = sphi %s3842_s18, %s5318_s18  }
   0x5   : > { %s3867_s24 = sadd.s32 1, %s3804_s21   ;;  %s136_s25 = sadd.s32 1, %s3800_s20 }
   0x6   : > { %s133_s26 = ssub.s32 %s3804_s21, %s3867_s24  ;;  %p146_p0 = scmp.ne.s32.totalorder %s3800_s20, %s3796_s19 }
   0x7   : > { %p134_p1 = scmp.eq.s32.totalorder %s133_s26, 0  ;;  %p147_p2 = scmp.eq.s32.totalorder %s3863_s22, 1 }
   0x8   : > { %p152_p3 = scmp.ne.s32.totalorder %s3796_s19, %s3792_s18  ;;  %p153_p4 = scmp.eq.s32.totalorder %s2902_s23, 1 }
   0x9   : > { %s3878_s27 = scalar_select %p134_p1, %s3800_s20, %s136_s25  }
   0xa   : > { %p3880_p5 = por %p147_p2, %p146_p0  ;;  %p3884_p6 = por %p153_p4, %p152_p3 }
   0xb   : > { %p2903_p7 = scmp.ge.s32.totalorder %s3804_s21, 1  ;;  %p160_p8 = scmp.lt.s32.totalorder %s3804_s21, 3 }
   0xc   : > { %p3665_p9 = scmp.eq.s32.totalorder %s3863_s22, 0  ;;  %s177_s7 = sshll.u32 %s5156_s3, 4  ;;  %s178_s7 = int_to_ptr.hbm [resolvable:$true] %s177_s7 }
   0xd   : > { %p161_p10 = pnand %p2903_p7, %p160_p8  ;;  %s3806_s8 = smov [#allocation4]  }
   0xe   : > { %s179_s9 = sshll.u32 %s3806_s8, 4  ;;  %s3807_s10 = smov 64   ;;  %s180_s9 = int_to_ptr.vmem [resolvable:$true] %s179_s9 }
   0xf   : > { %p3657_p11 = pneg %p161_p10  ;;  %s3808_s11 = smov 4  }
  0x10   : > { %206 = sbr.rel (%p161_p10) target bundleno = 798 (0x31e), region = 40 }
  0x11   : > { %p3658_p12 = pnand %p3665_p9, %p3657_p11 }
  0x13   : > { %3660 = dma.hbm_to_vmem [thread:$0]  (!%p3658_p12), %s178_s7, 9216, %s180_s9, [#allocation5], %s3807_s10, %s3807_s10, %s3808_s11  }
  0x15   : > { %3783 = dma.done.wait (%p3665_p9), [#allocation5], 9216  }
  0x16   : > { %3785 = vsyncadd (%p3665_p9), [#allocation5], 4294958080  ;;  %p235_p13 = scmp.lt.s32.totalorder %s3863_s22, 1  ;;  %v3464_v0 = vld [vmem:[%s5154_s1] sm:$0xff]  ;;  %vm260_vm0 = vcmask 130048   ;;  %v3467_v6 = vld [vmem:[%s5155_s2 + $0x10] sm:$0xff] }
  0x17   : > { %271 = vmatpush.bf16.msra.mxu0 %v3464_v0  ;;  %v3465_v5 = vld [vmem:[%s5155_s2] sm:$0xff]  ;;  %v3466_v7 = vld [vmem:[%s5155_s2 + $0x8] sm:$0xff]  ;;  %v3468_v8 = vld [vmem:[%s5155_s2 + $0x18] sm:$0xff]  ;;  %vm646_vm1 = vcmask 1042432   ;;  %vm647_vm2 = vcmask 1046532   ;;  %vm1390_vm4 = vcmask 1040384  }
  0x18   : > { %s236_s12 = scalar_select %p235_p13, %s3863_s22, 1  ;;  %v3469_v9 = vld [vmem:[%s5155_s2 + $0x20] sm:$0xff]  ;;  %v3532_v10 = vld [vmem:[#allocation4 + $0x38] sm:$0xff]  ;;  %v3529_v17 = vld [vmem:[#allocation4 + $0x20] sm:$0xff]  ;;  %vm1391_vm5 = vcmask 1044484   ;;  %v5199_v49 = vmov 0 }
  0x19   : > { %2412 = vmatpush.bf16.msra.mxu2 %v3532_v10  ;;  %3633 = vmatpush.bf16.msra.mxu3 %v3532_v10  ;;  %v3470_v11 = vld [vmem:[%s5155_s2 + $0x28] sm:$0xff]  ;;  %v291_v12 = vld [vmem:[%s5155_s2 + $0x30] sm:$0x3]  ;;  %v3530_v16 = vld [vmem:[#allocation4 + $0x28] sm:$0xff]  ;;  %vm1018_vm7 = vcmask 1041408   ;;  %vm1019_vm8 = vcmask 1045508  }
  0x1a   : > { %s3462_s13 = sshll.u32 %s236_s12, 3  ;;  %v317_v13 = vunpack.c.l.b16 %v291_v12  ;;  %v3531_v15 = vld [vmem:[#allocation4 + $0x30] sm:$0xff]  ;;  %v3528_v18 = vld [vmem:[#allocation4 + $0x18] sm:$0xff]  ;;  %v3526_v25 = vld [vmem:[#allocation4 + $0x8] sm:$0xff]  ;;  %vm1195_vm10 = vsmask.f32 1280 }
  0x1b   : > { %s239_s16 = scalar_lea.vmem %s5153_s0, %s3462_s13  ;;  %v3548_v21 = vld [vmem:[#allocation4 + $0xb8] sm:$0xff]  ;;  %v3527_v22 = vld [vmem:[#allocation4 + $0x10] sm:$0xff]  ;;  %vm3937_vm3 = vmor %vm646_vm1, %vm647_vm2  ;;  %vm1196_vm11 = vsmask.f32 5392  ;;  %vm823_vm13 = vsmask.f32 2304 }
  0x1c   : > { %v3463_v1 = vld [vmem:[%s239_s16] sm:$0xff]  ;;  %v324_v14 = vpack.c.b16 %v317_v13, %v317_v13  ;;  %v3556_v23 = vld [vmem:[#allocation4 + $0xf8] sm:$0xff]  ;;  %v3525_v41 = vld [vmem:[#allocation4] sm:$0xff]  ;;  %vm824_vm14 = vsmask.f32 6416  ;;  %s232_s25 = sand.u32 1, %s3796_s19  }
  0x1d   : > { %2918 = vmatmul.msk.bf16.vlgmr.msra.gmra.mxu0 %vm260_vm0, %v3463_v1  ;;  %2413 = vmatpush.bf16.msra.mxu2 %v3531_v15  ;;  %v3547_v24 = vld [vmem:[#allocation4 + $0xb0] sm:$0xff]  ;;  %v3546_v40 = vld [vmem:[#allocation4 + $0xa8] sm:$0xff]  ;;  %vm3948_vm6 = vmor %vm1390_vm4, %vm1391_vm5  ;;  %vm455_vm15 = vsmask.f32 3328  ;;  %s3649_s26 = smul.u32 104, %s232_s25  ;;  %s3758_s16 = scalar_lea.hbm %s5158_s5, 208 }
  0x1e   : > { %3634 = vmatpush.bf16.msra.mxu3 %v3531_v15  ;;  %v3555_v26 = vld [vmem:[#allocation4 + $0xf0] sm:$0xff]  ;;  %v3554_v45 = vld [vmem:[#allocation4 + $0xe8] sm:$0xff]  ;;  %v5200_v49 = vsel %vm3948_vm6, 4294967295, %v5199_v49  ;;  %v3545_v55 = vld [vmem:[#allocation4 + $0xa0] sm:$0xff]  ;;  %s3650_s6 = smul.u32 104, %s3863_s22  ;;  %s2813_s22 = scalar_lea.sflag [#allocation6], %s232_s25 }
  0x1f   : > { %5201 = vst [vmem:[#allocation10_spill] sm:$0xff] %v5200_v49  ;;  %v3553_v59 = vld [vmem:[#allocation4 + $0xe0] sm:$0xff]  ;;  %v3544_v1 = vld [vmem:[#allocation4 + $0x98] sm:$0xff]  ;;  %vm3970_vm9 = vmor %vm1018_vm7, %vm1019_vm8  ;;  %s5061_s30 = scalar_lea.vmem [#allocation7], %s3649_s26 }
  0x20   : > { %v3552_v15 = vld [vmem:[#allocation4 + $0xd8] sm:$0xff]  ;;  %vm3998_vm12 = vmor %vm1195_vm10, %vm1196_vm11  ;;  %s2824_s9 = scalar_lea.hbm %s5158_s5, %s3650_s6  ;;  %s2825_s10 = sshll.u32 %s5061_s30, 4  ;;  %s2826_s10 = int_to_ptr.vmem [resolvable:$true] %s2825_s10 }
  0x21   : > { %2414 = vmatpush.bf16.msra.mxu2 %v3530_v16  ;;  %vm4317_vm1 = vmor %vm823_vm13, %vm824_vm14  ;;  %v3576_v36 = vld [vmem:[#allocation4 + $0x198] sm:$0xff]  ;;  %s2827_s11 = sshll.u32 %s2824_s9, 4  ;;  %s2828_s11 = int_to_ptr.hbm [resolvable:$true] %s2827_s11 }
  0x22   : > { %3635 = vmatpush.bf16.msra.mxu3 %v3530_v16  ;;  %s3752_s12 = sshra.s32 %s2828_s11, 4  ;;  %s3753_s12 = int_to_ptr.hbm [resolvable:$true] %s3752_s12 }
  0x23   : > { %s3754_s13 = scalar_lea.hbm %s3753_s12, 104  ;;  %p3759_p3 = scmp.lt.s32.totalorder %s3753_s12, %s5158_s5 }
  0x24   : > { %p3755_p0 = scmp.ne.s32.totalorder %s3753_s12, %s3754_s13  ;;  %p3760_p4 = scmp.lt.s32.totalorder %s3758_s16, %s3754_s13 }
  0x25   : > { %2415 = vmatpush.bf16.msra.mxu2 %v3529_v17 }
  0x26   : > { %3636 = vmatpush.bf16.msra.mxu3 %v3529_v17  ;;  %p3756_p1 = pnand %p3755_p0, %p3880_p5  ;;  %p3761_p7 = por %p3760_p4, %p3759_p3 }
  0x28   : > { %p3757_p2 = pneg %p3756_p1 }
  0x29   : > { %2416 = vmatpush.bf16.msra.mxu2 %v3528_v18 }
  0x2a   : > { %3637 = vmatpush.bf16.msra.mxu3 %v3528_v18  ;;  %p3762_p8 = pnand %p3761_p7, %p3757_p2 }
  0x2d   : > { %2417 = vmatpush.bf16.msra.mxu2 %v3527_v22 }
  0x2e   : > { %3638 = vmatpush.bf16.msra.mxu3 %v3527_v22 }
  0x31   : > { %2418 = vmatpush.bf16.msra.mxu2 %v3526_v25 }
  0x32   : > { %3639 = vmatpush.bf16.msra.mxu3 %v3526_v25 }
  0x35   : > { %2419 = vmatpush.bf16.msra.mxu2 %v3525_v41 }
  0x36   : > { %3640 = vmatpush.bf16.msra.mxu3 %v3525_v41 }
  0x9a   : > { %v273_v2 = vpop.f32.mrf.mxu0 }
  0xa2   : > { %v275_v3 = vpop.f32.mrf.mxu0 }
  0xa3   : > { %v278_v4 = vpack.c.bf16 %v275_v3, %v273_v2 }
  0xa5   : > { %353 = vmatpush.bf16.msrb.mxu0 %v278_v4  ;;  %3632 = vmatpush.bf16.msra.mxu1 %v278_v4 }
  0xa8   : > { %2943 = vmatmul.msk.bf16.vlgmr.msrb.gmra.mxu0 %vm260_vm0, %v3465_v5  ;;  %2945 = vmatmul.msk.bf16.vlgmr.msra.gmra.mxu1 %vm260_vm0, %v3467_v6 }
  0xa9   : > { %2498 = vmatpush.bf16.msra.mxu0 %v3548_v21  ;;  %2541 = vmatpush.bf16.msrb.mxu1 %v3556_v23 }
  0xad   : > { %2499 = vmatpush.bf16.msra.mxu0 %v3547_v24  ;;  %2542 = vmatpush.bf16.msrb.mxu1 %v3555_v26 }
  0xb1   : > { %2500 = vmatpush.bf16.msra.mxu0 %v3546_v40  ;;  %2543 = vmatpush.bf16.msrb.mxu1 %v3554_v45 }
  0xb5   : > { %2501 = vmatpush.bf16.msra.mxu0 %v3545_v55  ;;  %2544 = vmatpush.bf16.msrb.mxu1 %v3553_v59 }
  0xb8   : > { %2944 = vmatmul.msk.bf16.gmra.mxu0 %vm260_vm0, %v3466_v7  ;;  %2946 = vmatmul.msk.bf16.gmra.mxu1 %vm260_vm0, %v3468_v8  ;;  %v5202_v7 = vmov 0 }
  0xb9   : > { %2502 = vmatpush.bf16.msra.mxu0 %v3544_v1  ;;  %v5203_v7 = vsel %vm3970_vm9, 4294967295, %v5202_v7  ;;  %2545 = vmatpush.bf16.msrb.mxu1 %v3552_v15 }
  0xba   : > { %5204 = vst [vmem:[#allocation11_spill] sm:$0xff] %v5203_v7 }
  0xc8   : > { %2947 = vmatmul.msk.bf16.gmra.mxu1 %vm260_vm0, %v3469_v9 }
  0xd8   : > { %2948 = vmatmul.msk.bf16.gmra.mxu1 %vm260_vm0, %v3470_v11 }
  0xe8   : > { %2949 = vmatmul.msk.bf16.gmra.mxu1 %vm260_vm0, %v324_v14  ;;  %vm456_vm0 = vsmask.f32 7440 }
  0xe9   : > { %vm4345_vm2 = vmor %vm455_vm15, %vm456_vm0 }
 0x125   : > { %v355_v19 = vpop.f32.mrf.mxu0  ;;  %v365_v20 = vpop.f32.mrf.mxu1 }
 0x12d   : > { %v357_v27 = vpop.f32.mrf.mxu0  ;;  %v367_v28 = vpop.f32.mrf.mxu1 }
 0x12e   : > { %v3600_v29 = vpack.c.bf16 %v357_v27, %v355_v19  ;;  %v3610_v30 = vpack.c.bf16 %v367_v28, %v365_v20 }
 0x130   : > { %3601 = vst [vmem:[#allocation2] sm:$0xff] %v3600_v29  }
 0x131   : > { %3628 = vst [vmem:[#allocation2 + $0x10] sm:$0xff] %v3610_v30  }
 0x135   : > { %v360_v31 = vpop.f32.mrf.mxu0  ;;  %v370_v38 = vpop.f32.mrf.mxu1 }
 0x137   : > { %v618_v32 = vld [vmem:[#allocation2] sm:$0xe]  ;;  %v619_v33 = vld [vmem:[#allocation2 + $0x4] sm:$0xf] }
 0x138   : > { %v2950_v34 = vrot.slane %v618_v32, 9  ;;  %v651_v35 = vrot.slane %v619_v33, 5  ;;  %v3943_v44 = vld [vmem:[#allocation2 + $0x10] sm:$0xf]  ;;  %v3945_v46 = vld [vmem:[#allocation2 + $0x14] sm:$0xf] }
 0x139   : > { %v1398_v47 = vrot.slane %v3943_v44, 7  ;;  %v415_v50 = vld [vmem:[#allocation2] sm:$0xf]  ;;  %v1401_v52 = vrot.slane %v3945_v46, 7  ;;  %v416_v53 = vld [vmem:[#allocation2 + $0x4] sm:$0xf] }
 0x13a   : > { %v652_v37 = vsel %vm3937_vm3, %v2950_v34, %v651_v35  ;;  %428 = vst [vmem:[#allocation3] sm:$0xf] %v415_v50  ;;  %v990_v57 = vld [vmem:[#allocation2 + $0x4] sm:$0xc]  ;;  %v653_v60 = vrot.slane %v651_v35, 4  ;;  %v5206_v50 = vmov 0 }
 0x13b   : > { %702 = vst [vmem:[#allocation3 + $0x8] sm:$0xf] %v652_v37  ;;  %v1400_v51 = vrot.slane %v1398_v47, 4  ;;  %v2952_v62 = vrot.slane %v990_v57, 10  ;;  %v1183_v63 = vld [vmem:[#allocation2 + $0x10] sm:$0xf] }
 0x13c   : > { %429 = vst [vmem:[#allocation3 + $0x24] sm:$0xf] %v416_v53  ;;  %v1218_v5 = vshrl.u32 %v1183_v63, 16  ;;  %v1221_v16 = vshll.u32 %v1183_v63, 16  ;;  %v5207_v50 = vsel %vm3998_vm12, 4294967295, %v5206_v50  ;;  %v3542_v57 = vld [vmem:[#allocation4 + $0x88] sm:$0xff] }
 0x13d   : > { %v362_v39 = vpop.f32.mrf.mxu0  ;;  %v372_v43 = vpop.f32.mrf.mxu1  ;;  %v1402_v54 = vsel %vm3948_vm6, %v1400_v51, %v1401_v52  ;;  %5208 = vst [vmem:[#allocation13_spill] sm:$0xff] %v5207_v50  ;;  %v441_v53 = vld [vmem:[#allocation2] sm:$0xf]  ;;  %v809_v44 = vld [vmem:[#allocation2 + $0x4] sm:$0xe] }
 0x13e   : > { %v3605_v42 = vpack.c.bf16 %v362_v39, %v360_v31  ;;  %v3615_v48 = vpack.c.bf16 %v372_v43, %v370_v38  ;;  %1448 = vst [vmem:[#allocation3 + $0x68] sm:$0xf] %v1402_v54  ;;  %v3543_v31 = vld [vmem:[#allocation4 + $0x90] sm:$0xff]  ;;  %v1220_v33 = vrot.slane %v1218_v5, 6  ;;  %v1223_v34 = vrot.slane %v1221_v16, 7 }
 0x13f   : > { %2503 = vmatpush.bf16.msra.mxu0 %v3543_v31  ;;  %v442_v54 = vld [vmem:[#allocation2 + $0x4] sm:$0xf]  ;;  %v462_v59 = vshll.u32 %v441_v53, 16  ;;  %v827_v63 = vshrl.u32 %v809_v44, 16  ;;  %v830_v1 = vshll.u32 %v809_v44, 16 }
 0x140   : > { %3627 = vst [vmem:[#allocation2 + $0x8] sm:$0xff] %v3605_v42   ;;  %v3551_v42 = vld [vmem:[#allocation4 + $0xd0] sm:$0xff] }
 0x141   : > { %3629 = vst [vmem:[#allocation2 + $0x18] sm:$0xff] %v3615_v48   ;;  %v3995_v48 = vor.u32 %v1223_v34, %v1220_v33  ;;  %2546 = vmatpush.bf16.msrb.mxu1 %v3551_v42  ;;  %v3563_v50 = vld [vmem:[#allocation4 + $0x130] sm:$0xff] }
 0x143   : > { %5205 = vst [vmem:[#allocation12_spill] sm:$0xff] %v3995_v48  ;;  %2504 = vmatpush.bf16.msra.mxu0 %v3542_v57 }
 0x145   : > { %v3961_v58 = vpop.f32.mrf.mxu1 }
 0x147   : > { %v3959_v56 = vld [vmem:[#allocation2 + $0x8] sm:$0xf]  ;;  %v3964_v2 = vld [vmem:[#allocation2 + $0xc] sm:$0xf] }
 0x148   : > { %v5168_v61 = vrot.slane %v3959_v56, 5  ;;  %v991_v0 = vld [vmem:[#allocation2 + $0x8] sm:$0xf]  ;;  %v5165_v8 = vrot.slane %v3964_v2, 6  ;;  %v3975_v9 = vld [vmem:[#allocation2 + $0xc] sm:$0xf] }
 0x149   : > { %v1023_v3 = vrot.slane %v991_v0, 6  ;;  %v1087_v4 = vld [vmem:[#allocation2 + $0x8] sm:$0xc]  ;;  %v5164_v13 = vrot.slane %v3975_v9, 6  ;;  %v1182_v17 = vld [vmem:[#allocation2 + $0xc] sm:$0xf] }
 0x14a   : > { %v655_v6 = vsel %vm3937_vm3, %v653_v60, %v5168_v61  ;;  %v2953_v12 = vrot.slane %v1087_v4, 10  ;;  %v1181_v14 = vld [vmem:[#allocation2 + $0x8] sm:$0xc]  ;;  %v1363_v24 = vld [vmem:[#allocation2 + $0xc] sm:$0xf]  ;;  %v1208_v26 = vshrl.u32 %v1182_v17, 16 }
 0x14b   : > { %v1024_v10 = vsel %vm3970_vm9, %v2952_v62, %v1023_v3  ;;  %v1025_v11 = vrot.slane %v1023_v3, 4  ;;  %v1199_v18 = vshrl.u32 %v1181_v14, 16  ;;  %v1362_v19 = vld [vmem:[#allocation2 + $0x8] sm:$0x8]  ;;  %v1202_v23 = vshll.u32 %v1181_v14, 16  ;;  %v3550_v4 = vld [vmem:[#allocation4 + $0xc8] sm:$0xff] }
 0x14c   : > { %v1118_v22 = vsel %vm3970_vm9, %v2953_v12, %v5164_v13  ;;  %703 = vst [vmem:[#allocation3 + $0x2c] sm:$0xf] %v655_v6  ;;  %v1211_v27 = vshll.u32 %v1182_v17, 16  ;;  %v2954_v29 = vrot.slane %v1362_v19, 11  ;;  %v1395_v30 = vrot.slane %v1363_v24, 7  ;;  %2547 = vmatpush.bf16.msrb.mxu1 %v3550_v4  ;;  %v3541_v14 = vld [vmem:[#allocation4 + $0x80] sm:$0xff] }
 0x14d   : > { %v377_v20 = vpop.f32.mrf.mxu1  ;;  %v1027_v21 = vsel %vm3970_vm9, %v1025_v11, %v5165_v8  ;;  %v1201_v25 = vrot.slane %v1199_v18, 6  ;;  %1074 = vst [vmem:[#allocation3 + $0x14] sm:$0xf] %v1024_v10  ;;  %v1204_v28 = vrot.slane %v1202_v23, 7  ;;  %v1210_v35 = vrot.slane %v1208_v26, 6  ;;  %2505 = vmatpush.bf16.msra.mxu0 %v3541_v14 }
 0x14e   : > { %1075 = vst [vmem:[#allocation3 + $0x38] sm:$0xf] %v1027_v21  ;;  %v3620_v32 = vpack.c.bf16 %v377_v20, %v3961_v58  ;;  %v1213_v37 = vrot.slane %v1211_v27, 7  ;;  %v1396_v39 = vsel %vm3948_vm6, %v2954_v29, %v1395_v30  ;;  %v1397_v40 = vrot.slane %v1395_v30, 4  ;;  %v445_v0 = vld [vmem:[#allocation2 + $0x10] sm:$0xf] }
 0x14f   : > { %1168 = vst [vmem:[#allocation3 + $0x18] sm:$0xf] %v1118_v22  ;;  %v1205_v38 = vor.u32 %v1204_v28, %v1201_v25  ;;  %v459_v58 = vshrl.u32 %v441_v53, 16  ;;  %v468_v60 = vshll.u32 %v442_v54, 16  ;;  %v472_v62 = vshrl.u32 %v442_v54, 16  ;;  %v3549_v27 = vld [vmem:[#allocation4 + $0xc0] sm:$0xff] }
 0x150   : > { %v1214_v41 = vor.u32 %v1213_v37, %v1210_v35  ;;  %1446 = vst [vmem:[#allocation3 + $0x20] sm:$0xf] %v1396_v39  ;;  %v1399_v45 = vsel %vm3948_vm6, %v1397_v40, %v1398_v47  ;;  %v446_v3 = vld [vmem:[#allocation2 + $0x14] sm:$0xf]  ;;  %v464_v10 = vrot.slane %v462_v59, 5  ;;  %v498_v11 = vshll.u32 %v445_v0, 16  ;;  %2548 = vmatpush.bf16.msrb.mxu1 %v3549_v27 }
 0x151   : > { %v1206_v43 = vrot.slane %v1205_v38, 4  ;;  %3630 = vst [vmem:[#allocation2 + $0x20] sm:$0xff] %v3620_v32   ;;  %v461_v6 = vrot.slane %v459_v58, 4  ;;  %v502_v12 = vshrl.u32 %v445_v0, 16  ;;  %v4007_v15 = vrot.slane %v468_v60, 5 }
 0x152   : > { %v1216_v51 = vrot.slane %v1214_v41, 4  ;;  %1447 = vst [vmem:[#allocation3 + $0x44] sm:$0xf] %v1399_v45  ;;  %v474_v16 = vrot.slane %v472_v62, 4  ;;  %v829_v17 = vrot.slane %v827_v63, 5  ;;  %v508_v18 = vshll.u32 %v446_v3, 16 }
 0x153   : > { %v1215_v55 = vsel %vm3998_vm12, %v1206_v43, %v1214_v41  ;;  %v4009_v19 = vld [vmem:[#allocation2 + $0x18] sm:$0xf]  ;;  %v832_v20 = vrot.slane %v830_v1, 6  ;;  %v512_v21 = vshrl.u32 %v446_v3, 16  ;;  %v4011_v22 = vld [vmem:[#allocation2 + $0x10] sm:$0xf]  ;;  %v465_v28 = vor.u32 %v464_v10, %v461_v6 }
 0x154   : > { %v1225_v47 = vsel %vm3998_vm12, %v1216_v51, %v3995_v48  ;;  %1349 = vst [vmem:[#allocation3 + $0x1c] sm:$0xf] %v1215_v55  ;;  %v4013_v23 = vld [vmem:[#allocation2 + $0x14] sm:$0xf]  ;;  %v1403_v24 = vrot.slane %v1401_v52, 4  ;;  %v5160_v25 = vrot.slane %v4009_v19, 7  ;;  %v475_v33 = vor.u32 %v474_v16, %v4007_v15 }
 0x155   : > { %1350 = vst [vmem:[#allocation3 + $0x40] sm:$0xf] %v1225_v47  ;;  %v380_v5 = vpop.f32.mrf.mxu1  ;;  %v2957_v26 = vld [vmem:[#allocation3] sm:$0xf]  ;;  %v4018_v29 = vld [vmem:[#allocation2 + $0x4] sm:$0xe]  ;;  %v833_v38 = vor.u32 %v832_v20, %v829_v17 }
 0x156   : > { %v4020_v30 = vrot.slane %v498_v11, 5  ;;  %v504_v31 = vrot.slane %v502_v12, 4  ;;  %v3475_v32 = vld [vmem:[#allocation3 + $0x20] sm:$0xf0]  ;;  %v4023_v34 = vrot.slane %v508_v18, 5  ;;  %v1405_v46 = vsel %vm3948_vm6, %v1403_v24, %v5160_v25 }
 0x157   : > { %v4025_v35 = vld [vmem:[#allocation2 + $0x10] sm:$0xf]  ;;  %v4027_v37 = vld [vmem:[#allocation2 + $0x14] sm:$0xf]  ;;  %v2958_v52 = vor.u32 %v3475_v32, %v2957_v26  ;;  %v514_v39 = vrot.slane %v512_v21, 4  ;;  %v5163_v40 = vrot.slane %v4011_v22, 5 }
 0x158   : > { %5209 = vst [vmem:[#allocation14_spill] sm:$0xff] %v4023_v34  ;;  %v5159_v41 = vrot.slane %v4013_v23, 5  ;;  %v505_v45 = vor.u32 %v504_v31, %v4020_v30  ;;  %v5162_v51 = vrot.slane %v4025_v35, 5  ;;  %v5161_v53 = vrot.slane %v4027_v37, 5  ;;  %v812_v54 = vld [vmem:[#allocation2 + $0x10] sm:$0xf] }
 0x159   : > { %1449 = vst [vmem:[#allocation3 + $0x8c] sm:$0xf] %v1405_v46  ;;  %2420 = vmatmul.bf16.vlgmr.msra.gmra.mxu2 %v2958_v52  ;;  %v716_v55 = vld [vmem:[#allocation2 + $0x8] sm:$0xf]  ;;  %v4038_v44 = vrot.slane %v465_v28, 4  ;;  %v4040_v47 = vrot.slane %v475_v33, 4  ;;  %v515_v60 = vor.u32 %v514_v39, %v4023_v34 }
 0x15a   : > { %v2951_v57 = vrot.slane %v4018_v29, 9  ;;  %v813_v58 = vld [vmem:[#allocation2 + $0x14] sm:$0xf]  ;;  %v4043_v59 = vrot.slane %v833_v38, 4  ;;  %v4048_v62 = vrot.slane %v5163_v40, 4  ;;  %v4052_v63 = vrot.slane %v5159_v41, 4 }
 0x15b   : > { %v1184_v0 = vld [vmem:[#allocation2 + $0x14] sm:$0xf]  ;;  %v856_v1 = vshrl.u32 %v812_v54, 16  ;;  %v859_v3 = vshll.u32 %v812_v54, 16  ;;  %v4054_v4 = vld [vmem:[#allocation2 + $0x10] sm:$0xf] }
 0x15c   : > { %5210 = vst [vmem:[#allocation15_spill] sm:$0xff] %v4054_v4  ;;  %v4056_v6 = vrot.slane %v505_v45, 4  ;;  %v4060_v10 = vrot.slane %v5162_v51, 4  ;;  %v4064_v11 = vrot.slane %v5161_v53, 4  ;;  %v866_v12 = vshrl.u32 %v813_v58, 16 }
 0x15d   : > { %v382_v42 = vpop.f32.mrf.mxu1  ;;  %v4066_v14 = vld [vmem:[#allocation2 + $0x14] sm:$0xf]  ;;  %v4068_v16 = vld [vmem:[#allocation2 + $0x10] sm:$0xf]  ;;  %v1228_v18 = vshrl.u32 %v1184_v0, 16  ;;  %v1231_v20 = vshll.u32 %v1184_v0, 16 }
 0x15e   : > { %v3625_v43 = vpack.c.bf16 %v382_v42, %v380_v5  ;;  %v745_v5 = vrot.slane %v716_v55, 5  ;;  %5211 = vst [vmem:[#allocation16_spill] sm:$0xff] %v4056_v6  ;;  %v4070_v17 = vld [vmem:[#allocation2 + $0x14] sm:$0xf]  ;;  %v4072_v21 = vrot.slane %v515_v60, 4  ;;  %v869_v24 = vshll.u32 %v813_v58, 16 }
 0x15f   : > { %5212 = vst [vmem:[#allocation17_spill] sm:$0xff] %v4066_v14  ;;  %v443_v26 = vld [vmem:[#allocation2 + $0x8] sm:$0xf]  ;;  %v4074_v27 = vld [vmem:[#allocation2 + $0xc] sm:$0xf]  ;;  %v4076_v28 = vrot.slane %v856_v1, 5 }
 0x160   : > { %3631 = vst [vmem:[#allocation2 + $0x28] sm:$0xff] %v3625_v43   ;;  %v4078_v29 = vrot.slane %v859_v3, 6  ;;  %v444_v32 = vld [vmem:[#allocation2 + $0xc] sm:$0xf]  ;;  %v747_v33 = vrot.slane %v745_v5, 4  ;;  %v4081_v46 = vrot.slane %v866_v12, 5  ;;  %v746_v1 = vsel %vm3937_vm3, %v2951_v57, %v745_v5 }
 0x161   : > { %5213 = vst [vmem:[#allocation18_spill] sm:$0xff] %v4068_v16  ;;  %v5166_v38 = vrot.slane %v4068_v16, 6  ;;  %v5169_v39 = vrot.slane %v4070_v17, 6  ;;  %v1230_v42 = vrot.slane %v1228_v18, 6  ;;  %v1233_v43 = vrot.slane %v1231_v20, 7 }
 0x162   : > { %5214 = vst [vmem:[#allocation19_spill] sm:$0xff] %v4070_v17  ;;  %v478_v45 = vshll.u32 %v443_v26, 16  ;;  %v5167_v54 = vrot.slane %v4074_v27, 5  ;;  %v482_v55 = vshrl.u32 %v443_v26, 16  ;;  %v488_v58 = vshll.u32 %v444_v32, 16  ;;  %v3564_v26 = vld [vmem:[#allocation4 + $0x138] sm:$0xff] }
 0x163   : > { %5215 = vst [vmem:[#allocation20_spill] sm:$0xff] %v4072_v21  ;;  %v810_v60 = vld [vmem:[#allocation2 + $0x8] sm:$0xf]  ;;  %v447_v3 = vld [vmem:[#allocation2 + $0x18] sm:$0xf]  ;;  %v492_v20 = vshrl.u32 %v444_v32, 16  ;;  %2584 = vmatpush.bf16.msrb.mxu2 %v3564_v26 }
 0x164   : > { %v417_v0 = vld [vmem:[#allocation2 + $0x8] sm:$0xf]  ;;  %v418_v12 = vld [vmem:[#allocation2 + $0xc] sm:$0xf]  ;;  %v749_v52 = vsel %vm3937_vm3, %v747_v33, %v5167_v54  ;;  %v448_v31 = vld [vmem:[#allocation2 + $0x1c] sm:$0xf] }
 0x165   : > { %430 = vst [vmem:[#allocation3 + $0x48] sm:$0xf] %v417_v0  ;;  %v4093_v18 = vpop.f32.mrf.mxu1  ;;  %v2965_v41 = vld [vmem:[#allocation3 + $0x8] sm:$0xf]  ;;  %v3476_v25 = vld [vmem:[#allocation3 + $0x28] sm:$0xf0] }
 0x166   : > { %431 = vst [vmem:[#allocation3 + $0x6c] sm:$0xf] %v418_v12  ;;  %v4095_v53 = vld [vmem:[#allocation2 + $0xc] sm:$0xf]  ;;  %v836_v57 = vshrl.u32 %v810_v60, 16  ;;  %v839_v5 = vshll.u32 %v810_v60, 16  ;;  %v2966_v51 = vor.u32 %v3476_v25, %v2965_v41 }
 0x167   : > { %796 = vst [vmem:[#allocation3 + $0xc] sm:$0xf] %v746_v1  ;;  %v4097_v0 = vrot.slane %v869_v24, 6  ;;  %v4101_v33 = vrot.slane %v5166_v38, 4  ;;  %v518_v32 = vshll.u32 %v447_v3, 16  ;;  %v522_v40 = vshrl.u32 %v447_v3, 16  ;;  %2585 = vmatpush.bf16.msrb.mxu2 %v3563_v50 }
 0x168   : > { %797 = vst [vmem:[#allocation3 + $0x30] sm:$0xf] %v749_v52  ;;  %v4103_v12 = vrot.slane %v478_v45, 5  ;;  %v484_v13 = vrot.slane %v482_v55, 4  ;;  %v528_v8 = vshll.u32 %v448_v31, 16  ;;  %v532_v1 = vshrl.u32 %v448_v31, 16  ;;  %2506 = vmatmul.bf16.vlgmr.msra.gmra.mxu0 %v2966_v51 }
 0x169   : > { %5216 = vst [vmem:[#allocation21_spill] sm:$0xff] %v4101_v33  ;;  %v4107_v60 = vrot.slane %v5169_v39, 4  ;;  %v4109_v25 = vrot.slane %v488_v58, 5  ;;  %v494_v41 = vrot.slane %v492_v20, 4  ;;  %v4112_v52 = vor.u32 %v1233_v43, %v1230_v42  ;;  %v811_v26 = vld [vmem:[#allocation2 + $0xc] sm:$0xf] }
 0x16a   : > { %v838_v38 = vrot.slane %v836_v57, 5  ;;  %v841_v3 = vrot.slane %v839_v5, 6  ;;  %v4114_v54 = vrot.slane %v518_v32, 5  ;;  %v524_v55 = vrot.slane %v522_v40, 4  ;;  %v4116_v31 = vld [vmem:[#allocation2 + $0x18] sm:$0xf] }
 0x16b   : > { %5217 = vst [vmem:[#allocation22_spill] sm:$0xff] %v4107_v60  ;;  %v485_v39 = vor.u32 %v484_v13, %v4103_v12  ;;  %v4119_v58 = vrot.slane %v528_v8, 5  ;;  %v534_v20 = vrot.slane %v532_v1, 4  ;;  %v4121_v14 = vld [vmem:[#allocation2 + $0x1c] sm:$0xf]  ;;  %v495_v5 = vor.u32 %v494_v41, %v4109_v25  ;;  %v3540_v1 = vld [vmem:[#allocation4 + $0x78] sm:$0xff] }
 0x16c   : > { %5218 = vst [vmem:[#allocation23_spill] sm:$0xff] %v4112_v52  ;;  %v2993_v45 = vld [vmem:[#allocation3 + $0x48] sm:$0xf]  ;;  %v846_v32 = vshrl.u32 %v811_v26, 16  ;;  %v4125_v24 = vld [vmem:[#allocation2 + $0x18] sm:$0xf]  ;;  %2455 = vmatpush.bf16.msrb.mxu3 %v3540_v1 }
 0x16d   : > { %5219 = vst [vmem:[#allocation24_spill] sm:$0xff] %v4114_v54  ;;  %v3484_v51 = vld [vmem:[#allocation3 + $0x68] sm:$0xf0]  ;;  %v387_v61 = vpop.f32.mrf.mxu1  ;;  %v849_v13 = vshll.u32 %v811_v26, 16  ;;  %v5221_v49 = vrot.slane %v3959_v56, 5  ;;  %v5181_v41 = vrot.slane %v4116_v31, 5  ;;  %v535_v26 = vor.u32 %v534_v20, %v4119_v58 }
 0x16e   : > { %5220 = vst [vmem:[#allocation25_spill] sm:$0xff] %v4119_v58  ;;  %v2994_v42 = vor.u32 %v3484_v51, %v2993_v45  ;;  %v3472_v43 = vld [vmem:[#allocation3 + $0xc] sm:$0xf]  ;;  %v4128_v61 = vor.u32 %v841_v3, %v838_v38  ;;  %v525_v51 = vor.u32 %v524_v55, %v4114_v54  ;;  %v4137_v48 = vrot.slane %v485_v39, 4  ;;  %v3539_v56 = vld [vmem:[#allocation4 + $0x70] sm:$0xff]  ;;  %v3538_v17 = vld [vmem:[#allocation4 + $0x68] sm:$0xff] }
 0x16f   : > { %v2967_v40 = vld [vmem:[#allocation3 + $0x2c] sm:$0xf0]  ;;  %v4132_v45 = vrot.slane %v5221_v49, 4  ;;  %v5222_v38 = vrot.slane %v4095_v53, 5  ;;  %v4147_v55 = vrot.slane %v495_v5, 4  ;;  %v4153_v39 = vrot.slane %v846_v32, 5 }
 0x170   : > { %2425 = vmatmul.bf16.gmra.mxu2 %v2994_v42  ;;  %v2970_v8 = vor.u32 %v3472_v43, %v2967_v40  ;;  %v4144_v42 = vld [vmem:[#allocation2 + $0x1c] sm:$0xf]  ;;  %v5223_v43 = vrot.slane %v4074_v27, 5  ;;  %v814_v4 = vld [vmem:[#allocation2 + $0x18] sm:$0xf]  ;;  %v4156_v57 = vrot.slane %v849_v13, 6  ;;  %2456 = vmatpush.bf16.msrb.mxu3 %v3539_v56  ;;  %v401_v56 = vpack.c.bf16 %v4093_v18, %v4093_v18 }
 0x171   : > { %v4141_v3 = vrot.slane %v5222_v38, 4  ;;  %v3562_v38 = vld [vmem:[#allocation4 + $0x128] sm:$0xff]  ;;  %v5224_v49 = vrot.slane %v3964_v2, 6  ;;  %v5226_v5 = vrot.slane %v3975_v9, 6  ;;  %v419_v27 = vld [vmem:[#allocation2 + $0x10] sm:$0xf] }
 0x172   : > { %2549 = vmatmul.bf16.vlgmr.msrb.gmra.mxu1 %v2970_v8  ;;  %v4151_v40 = vrot.slane %v5223_v43, 4  ;;  %v4166_v43 = vrot.slane %v525_v51, 4  ;;  %v4170_v32 = vrot.slane %v5181_v41, 4  ;;  %v5229_v50 = vrot.slane %v4121_v14, 5  ;;  %v420_v2 = vld [vmem:[#allocation2 + $0x14] sm:$0xf]  ;;  %2586 = vmatpush.bf16.msrb.mxu2 %v3562_v38 }
 0x173   : > { %v4160_v8 = vrot.slane %v5224_v49, 4  ;;  %v4164_v1 = vrot.slane %v5226_v5, 4  ;;  %v4177_v49 = vrot.slane %v535_v26, 4  ;;  %v5231_v9 = vrot.slane %v4125_v24, 5  ;;  %v1185_v60 = vld [vmem:[#allocation2 + $0x18] sm:$0xf] }
 0x174   : > { %5228 = vst [vmem:[#allocation28_spill] sm:$0xff] %v4166_v43  ;;  %v4174_v20 = vrot.slane %v5229_v50, 4  ;;  %v876_v51 = vshrl.u32 %v814_v4, 16  ;;  %v879_v52 = vshll.u32 %v814_v4, 16  ;;  %v4183_v41 = vld [vmem:[#allocation2 + $0x18] sm:$0xf]  ;;  %2457 = vmatpush.bf16.msrb.mxu3 %v3538_v17 }
 0x175   : > { %5225 = vst [vmem:[#allocation26_spill] sm:$0xff] %v4160_v8  ;;  %v4181_v5 = vrot.slane %v5231_v9, 4  ;;  %v815_v8 = vld [vmem:[#allocation2 + $0x1c] sm:$0xf]  ;;  %v3561_v50 = vld [vmem:[#allocation4 + $0x120] sm:$0xff]  ;;  %v1238_v7 = vshrl.u32 %v1185_v60, 16 }
 0x176   : > { %5227 = vst [vmem:[#allocation27_spill] sm:$0xff] %v4164_v1  ;;  %v1186_v33 = vld [vmem:[#allocation2 + $0x1c] sm:$0xf]  ;;  %v4185_v13 = vld [vmem:[#allocation2 + $0x18] sm:$0xf]  ;;  %v1241_v16 = vshll.u32 %v1185_v60, 16  ;;  %2587 = vmatpush.bf16.msrb.mxu2 %v3561_v50 }
 0x177   : > { %5230 = vst [vmem:[#allocation29_spill] sm:$0xff] %v4177_v49  ;;  %v4187_v26 = vld [vmem:[#allocation2 + $0x1c] sm:$0xf]  ;;  %v423_v9 = vld [vmem:[#allocation2 + $0x20] sm:$0xf]  ;;  %v1248_v49 = vshrl.u32 %v1186_v33, 16 }
 0x178   : > { %5232 = vst [vmem:[#allocation30_spill] sm:$0xff] %v4183_v41  ;;  %v424_v1 = vld [vmem:[#allocation2 + $0x24] sm:$0xf]  ;;  %v4189_v4 = vld [vmem:[#allocation2 + $0x1c] sm:$0xf]  ;;  %v5234_v38 = vrot.slane %v4144_v42, 5 }
 0x179   : > { %432 = vst [vmem:[#allocation3 + $0x90] sm:$0xf] %v419_v27  ;;  %v886_v43 = vshrl.u32 %v815_v8, 16  ;;  %v889_v58 = vshll.u32 %v815_v8, 16  ;;  %v4197_v21 = vrot.slane %v876_v51, 5  ;;  %v4199_v60 = vrot.slane %v879_v52, 6 }
 0x17a   : > { %433 = vst [vmem:[#allocation3 + $0xb4] sm:$0xf] %v420_v2  ;;  %v4195_v27 = vrot.slane %v5234_v38, 4  ;;  %v3560_v2 = vld [vmem:[#allocation4 + $0x118] sm:$0xff]  ;;  %v3809_v6 = vmov 0   ;;  %v1240_v38 = vrot.slane %v1238_v7, 6 }
 0x17b   : > { %5233 = vst [vmem:[#allocation31_spill] sm:$0xff] %v4189_v4  ;;  %v1243_v8 = vrot.slane %v1241_v16, 7  ;;  %v5235_v52 = vrot.slane %v4095_v53, 5  ;;  %v449_v51 = vld [vmem:[#allocation2 + $0x20] sm:$0xf]  ;;  %v5236_v17 = vrot.slane %v4011_v22, 5  ;;  %2588 = vmatpush.bf16.msrb.mxu2 %v3560_v2 }
 0x17c   : > { %436 = vst [vmem:[#allocation3 + $0x120] sm:$0xf] %v423_v9  ;;  %v1251_v9 = vshll.u32 %v1186_v33, 16  ;;  %v5237_v53 = vrot.slane %v4025_v35, 5  ;;  %v4222_v34 = vrot.slane %v886_v43, 5  ;;  %v5238_v18 = vrot.slane %v4027_v37, 5 }
 0x17d   : > { %437 = vst [vmem:[#allocation3 + $0x144] sm:$0xf] %v424_v1  ;;  %v1250_v1 = vrot.slane %v1248_v49, 6  ;;  %v658_v33 = vsel %vm3937_vm3, %v4132_v45, %v5235_v52  ;;  %v661_v7 = vsel %vm3937_vm3, %v4141_v3, %v5236_v17  ;;  %v4215_v49 = vld [vmem:[#allocation2 + $0x24] sm:$0xf]  ;;  %v3537_v52 = vld [vmem:[#allocation4 + $0x60] sm:$0xff] }
 0x17e   : > { %241 = vst [vmem:[#allocation2 + $0x30] sm:$0xc] %v3809_v6  ;;  %v1253_v16 = vrot.slane %v1251_v9, 7  ;;  %v752_v45 = vsel %vm3937_vm3, %v4151_v40, %v5237_v53  ;;  %v755_v3 = vsel %vm3937_vm3, %v4060_v10, %v5238_v18  ;;  %v3559_v2 = vld [vmem:[#allocation4 + $0x110] sm:$0xff]  ;;  %2458 = vmatpush.bf16.msrb.mxu3 %v3537_v52  ;;  %v5239_v40 = vrot.slane %v4185_v13, 6 }
 0x17f   : > { %244 = vst [vmem:[#allocation2 + $0x3c] sm:$0xf] %v3809_v6  ;;  %v5241_v9 = vrot.slane %v4187_v26, 6  ;;  %v5243_v37 = vrot.slane %v4009_v19, 7  ;;  %2589 = vmatpush.bf16.msrb.mxu2 %v3559_v2  ;;  %v4243_v18 = vor.u32 %v1243_v8, %v1240_v38  ;;  %v538_v53 = vshll.u32 %v449_v51, 16 }
 0x180   : > { %v3029_v50 = vld [vmem:[#allocation3 + $0x90] sm:$0xf]  ;;  %414 = vst [vmem:[#allocation2 + $0x30] sm:$0x3] %v401_v56  ;;  %v4233_v43 = vrot.slane %v5239_v40, 4  ;;  %v542_v52 = vshrl.u32 %v449_v51, 16 }
 0x181   : > { %v3493_v54 = vld [vmem:[#allocation3 + $0xb0] sm:$0xf0]  ;;  %242 = vst [vmem:[#allocation2 + $0x34] sm:$0xf] %v3809_v6  ;;  %v4237_v17 = vrot.slane %v5241_v9, 4  ;;  %v548_v40 = vshll.u32 %v4215_v49, 16 }
 0x182   : > { %v3030_v56 = vor.u32 %v3493_v54, %v3029_v50  ;;  %243 = vst [vmem:[#allocation2 + $0x38] sm:$0xf] %v3809_v6  ;;  %v4229_v54 = vrot.slane %v889_v58, 6  ;;  %v3536_v6 = vld [vmem:[#allocation4 + $0x58] sm:$0xff]  ;;  %v4241_v50 = vrot.slane %v5243_v37, 4  ;;  %v3558_v58 = vld [vmem:[#allocation4 + $0x108] sm:$0xff] }
 0x183   : > { %v3101_v22 = vld [vmem:[#allocation3 + $0x120] sm:$0xf]  ;;  %704 = vst [vmem:[#allocation3 + $0x50] sm:$0xf] %v658_v33  ;;  %v4245_v33 = vor.u32 %v1253_v16, %v1250_v1  ;;  %2459 = vmatpush.bf16.msrb.mxu3 %v3536_v6  ;;  %v552_v1 = vshrl.u32 %v4215_v49, 16  ;;  %2590 = vmatpush.bf16.msrb.mxu2 %v3558_v58  ;;  %v3557_v51 = vld [vmem:[#allocation4 + $0x100] sm:$0xff] }
 0x184   : > { %2430 = vmatmul.bf16.gmra.mxu2 %v3030_v56  ;;  %v3511_v35 = vld [vmem:[#allocation3 + $0x140] sm:$0xf0]  ;;  %705 = vst [vmem:[#allocation3 + $0x74] sm:$0xf] %v661_v7  ;;  %v5246_v7 = vrot.slane %v4189_v4, 7  ;;  %v4265_v37 = vrot.slane %v538_v53, 5 }
 0x185   : > { %5240 = vst [vmem:[#allocation32_spill] sm:$0xff] %v4233_v43  ;;  %v3102_v10 = vor.u32 %v3511_v35, %v3101_v22  ;;  %v4252_v19 = vld [vmem:[#allocation2 + $0x20] sm:$0xf]  ;;  %v4259_v16 = vld [vmem:[#allocation2 + $0x24] sm:$0xf]  ;;  %v544_v41 = vrot.slane %v542_v52, 4 }
 0x186   : > { %5242 = vst [vmem:[#allocation33_spill] sm:$0xff] %v4237_v17  ;;  %v4249_v56 = vrot.slane %v5246_v7, 4  ;;  %v4256_v2 = vld [vmem:[#allocation2 + $0x20] sm:$0xf]  ;;  %v3535_v9 = vld [vmem:[#allocation4 + $0x50] sm:$0xff] }
 0x187   : > { %5244 = vst [vmem:[#allocation34_spill] sm:$0xff] %v4241_v50  ;;  %2440 = vmatmul.bf16.vlgmr.msra.gmra.mxu3 %v3102_v10  ;;  %v453_v22 = vld [vmem:[#allocation2 + $0x30] sm:$0xf]  ;;  %v4261_v35 = vld [vmem:[#allocation2 + $0x20] sm:$0xf]  ;;  %2591 = vmatpush.bf16.msrb.mxu2 %v3557_v51  ;;  %v545_v58 = vor.u32 %v544_v41, %v4265_v37  ;;  %v5249_v51 = vrot.slane %v4013_v23, 5  ;;  %v4296_v23 = vor.u32 %v4156_v57, %v4153_v39 }
 0x188   : > { %798 = vst [vmem:[#allocation3 + $0x54] sm:$0xf] %v752_v45  ;;  %v4254_v45 = vld [vmem:[#allocation2 + $0x24] sm:$0xf]  ;;  %v578_v38 = vshll.u32 %v453_v22, 16  ;;  %v582_v8 = vshrl.u32 %v453_v22, 16  ;;  %2460 = vmatpush.bf16.msrb.mxu3 %v3535_v9 }
 0x189   : > { %5245 = vst [vmem:[#allocation35_spill] sm:$0xff] %v4245_v33  ;;  %v427_v7 = vld [vmem:[#allocation2 + $0x30] sm:$0xf]  ;;  %v4268_v22 = vrot.slane %v548_v40, 5  ;;  %v421_v53 = vld [vmem:[#allocation2 + $0x18] sm:$0xf]  ;;  %v664_v9 = vsel %vm3937_vm3, %v4048_v62, %v5249_v51 }
 0x18a   : > { %5247 = vst [vmem:[#allocation36_spill] sm:$0xff] %v4249_v56  ;;  %v4270_v6 = vrot.slane %v578_v38, 5  ;;  %v584_v49 = vrot.slane %v582_v8, 4  ;;  %v422_v4 = vld [vmem:[#allocation2 + $0x1c] sm:$0xf]  ;;  %v5250_v41 = vrot.slane %v4116_v31, 5 }
 0x18b   : > { %799 = vst [vmem:[#allocation3 + $0x78] sm:$0xf] %v755_v3  ;;  %v896_v3 = vshrl.u32 %v4261_v35, 16  ;;  %v3001_v10 = vld [vmem:[#allocation3 + $0x50] sm:$0xf]  ;;  %v899_v57 = vshll.u32 %v4261_v35, 16 }
 0x18c   : > { %5248 = vst [vmem:[#allocation37_spill] sm:$0xff] %v4270_v6  ;;  %v425_v52 = vld [vmem:[#allocation2 + $0x28] sm:$0xf]  ;;  %v426_v40 = vld [vmem:[#allocation2 + $0x2c] sm:$0xf]  ;;  %v585_v38 = vor.u32 %v584_v49, %v4270_v6  ;;  %v4287_v6 = vor.u32 %v4078_v29, %v4076_v28  ;;  %v5251_v28 = vrot.slane %v4125_v24, 5 }
 0x18d   : > { %440 = vst [vmem:[#allocation3 + $0x1b0] sm:$0xf] %v427_v7  ;;  %v3485_v8 = vld [vmem:[#allocation3 + $0x70] sm:$0xf0]  ;;  %v4278_v43 = vld [vmem:[#allocation2 + $0x24] sm:$0xf] }
 0x18e   : > { %v3002_v56 = vor.u32 %v3485_v8, %v3001_v10  ;;  %434 = vst [vmem:[#allocation3 + $0xd8] sm:$0xf] %v421_v53  ;;  %v454_v17 = vld [vmem:[#allocation2 + $0x34] sm:$0x1]  ;;  %v586_v62 = vrot.slane %v585_v38, 4  ;;  %v758_v29 = vsel %vm3937_vm3, %v4064_v11, %v5251_v28  ;;  %v5253_v39 = vrot.slane %v4144_v42, 5 }
 0x18f   : > { %v3481_v33 = vld [vmem:[#allocation3 + $0x54] sm:$0xf]  ;;  %435 = vst [vmem:[#allocation3 + $0xfc] sm:$0xf] %v422_v4  ;;  %v588_v49 = vshll.u32 %v454_v17, 16  ;;  %v667_v4 = vsel %vm3937_vm3, %v4052_v63, %v5250_v41  ;;  %v3534_v17 = vld [vmem:[#allocation4 + $0x48] sm:$0xff]  ;;  %v843_v42 = vsel %vm4317_vm1, %v4043_v59, %v4128_v61 }
 0x190   : > { %2511 = vmatmul.bf16.gmra.mxu0 %v3002_v56  ;;  %438 = vst [vmem:[#allocation3 + $0x168] sm:$0xf] %v425_v52  ;;  %v5252_v63 = vrot.slane %v4252_v19, 5  ;;  %v761_v24 = vsel %vm3937_vm3, %v4181_v5, %v5253_v39  ;;  %v5256_v10 = vrot.slane %v4254_v45, 5  ;;  %v5257_v35 = vrot.slane %v4256_v2, 5  ;;  %2461 = vmatpush.bf16.msrb.mxu3 %v3534_v17  ;;  %v3533_v5 = vld [vmem:[#allocation4 + $0x40] sm:$0xff] }
 0x191   : > { %439 = vst [vmem:[#allocation3 + $0x18c] sm:$0xf] %v426_v40  ;;  %v590_v31 = vrot.slane %v588_v49, 5  ;;  %v5258_v40 = vrot.slane %v4259_v16, 5  ;;  %v898_v38 = vrot.slane %v896_v3, 5  ;;  %v906_v8 = vshrl.u32 %v4278_v43, 16 }
 0x192   : > { %v3003_v50 = vld [vmem:[#allocation3 + $0x74] sm:$0xf0]  ;;  %v4307_v56 = vrot.slane %v5252_v63, 4  ;;  %706 = vst [vmem:[#allocation3 + $0x98] sm:$0xf] %v664_v9  ;;  %v4325_v53 = vrot.slane %v5256_v10, 4 }
 0x193   : > { %v3006_v7 = vor.u32 %v3481_v33, %v3003_v50  ;;  %v3580_v50 = vld [vmem:[#allocation4 + $0x1b8] sm:$0xff]  ;;  %v4303_v33 = vrot.slane %v552_v1, 4  ;;  %v4321_v1 = vrot.slane %v545_v58, 4  ;;  %v765_v52 = vrot.slane %v5257_v35, 4  ;;  %707 = vst [vmem:[#allocation3 + $0xbc] sm:$0xf] %v667_v4 }
 0x194   : > { %2670 = vmatpush.bf16.msrb.mxu0 %v3580_v50  ;;  %v4335_v58 = vrot.slane %v5258_v40, 4  ;;  %800 = vst [vmem:[#allocation3 + $0x9c] sm:$0xf] %v758_v29  ;;  %v4349_v9 = vld [vmem:[#allocation2 + $0x20] sm:$0xf]  ;;  %v901_v4 = vrot.slane %v899_v57, 6  ;;  %2462 = vmatpush.bf16.msrb.mxu3 %v3533_v5 }
 0x195   : > { %2554 = vmatmul.bf16.gmra.mxu1 %v3006_v7  ;;  %v5259_v7 = vrot.slane %v4128_v61, 4  ;;  %v4351_v49 = vld [vmem:[#allocation2 + $0x20] sm:$0xf]  ;;  %v4353_v3 = vld [vmem:[#allocation2 + $0x28] sm:$0xf]  ;;  %v591_v61 = vsel %vm4345_vm2, %v586_v62, %v590_v31  ;;  %v5262_v29 = vrot.slane %v4121_v14, 5  ;;  %v4372_v31 = vor.u32 %v4097_v0, %v4081_v46 }
 0x196   : > { %v3065_v41 = vld [vmem:[#allocation3 + $0xd8] sm:$0xf]  ;;  %801 = vst [vmem:[#allocation3 + $0xc0] sm:$0xf] %v761_v24  ;;  %v3502_v28 = vld [vmem:[#allocation3 + $0xf8] sm:$0xf0]  ;;  %v5265_v46 = vmov %v5258_v40  ;;  %v882_v40 = vor.u32 %v4199_v60, %v4197_v21  ;;  %v471_v60 = vsel %vm4345_vm2, %v4038_v44, %v4007_v15 }
 0x197   : > { %v853_v51 = vsel %vm4317_vm1, %v5259_v7, %v4296_v23  ;;  %977 = vst [vmem:[#allocation3 + $0x10] sm:$0xf] %v843_v42  ;;  %v670_v17 = vsel %vm3937_vm3, %v4170_v32, %v5262_v29  ;;  %v854_v50 = vrot.slane %v4296_v23, 4  ;;  %v909_v63 = vshll.u32 %v4278_v43, 16  ;;  %v3137_v10 = vld [vmem:[#allocation3 + $0x168] sm:$0xf] }
 0x198   : > { %v3066_v39 = vor.u32 %v3502_v28, %v3065_v41  ;;  %978 = vst [vmem:[#allocation3 + $0x34] sm:$0xf] %v853_v51  ;;  %v5263_v24 = vrot.slane %v4252_v19, 5  ;;  %v864_v14 = vrot.slane %v4287_v6, 4  ;;  %v4374_v32 = vld [vmem:[#allocation2 + $0x28] sm:$0xf]  ;;  %v5264_v43 = vmov %v5257_v35 }
 0x199   : > { %v3520_v23 = vld [vmem:[#allocation3 + $0x188] sm:$0xf0]  ;;  %617 = vst [vmem:[#allocation3 + $0x1b4] sm:$0xf] %v591_v61  ;;  %v764_v19 = vsel %vm3937_vm3, %v4195_v27, %v5264_v43  ;;  %v4381_v57 = vrot.slane %v906_v8, 5  ;;  %v767_v0 = vsel %vm3937_vm3, %v765_v52, %v5265_v46  ;;  %v1132_v2 = vrot.slane %v4349_v9, 6 }
 0x19a   : > { %v673_v62 = vsel %vm3937_vm3, %v4174_v20, %v5263_v24  ;;  %v769_v20 = vrot.slane %v4353_v3, 5  ;;  %2435 = vmatmul.bf16.gmra.mxu2 %v3066_v39  ;;  %v3138_v35 = vor.u32 %v3520_v23, %v3137_v10  ;;  %708 = vst [vmem:[#allocation3 + $0xe0] sm:$0xf] %v670_v17  ;;  %v4388_v42 = vld [vmem:[#allocation2 + $0x24] sm:$0xf]  ;;  %v1258_v5 = vshrl.u32 %v4351_v49, 16 }
 0x19b   : > { %709 = vst [vmem:[#allocation3 + $0x104] sm:$0xf] %v673_v62  ;;  %v863_v27 = vsel %vm4317_vm1, %v854_v50, %v4287_v6  ;;  %v1261_v8 = vshll.u32 %v4351_v49, 16  ;;  %v678_v16 = vrot.slane %v4374_v32, 5  ;;  %v3494_v52 = vld [vmem:[#allocation3 + $0xb8] sm:$0xf0]  ;;  %v873_v7 = vsel %vm4317_vm1, %v864_v14, %v4372_v31 }
 0x19c   : > { %2445 = vmatmul.bf16.gmra.mxu3 %v3138_v35  ;;  %802 = vst [vmem:[#allocation3 + $0xe4] sm:$0xf] %v764_v19  ;;  %v4404_v51 = vor.u32 %v4229_v54, %v4222_v34  ;;  %v4406_v3 = vld [vmem:[#allocation2 + $0x24] sm:$0xf]  ;;  %v4408_v6 = vld [vmem:[#allocation2 + $0x2c] sm:$0xf]  ;;  %v4414_v49 = vor.u32 %v901_v4, %v898_v38  ;;  %v481_v34 = vsel %vm4345_vm2, %v4040_v47, %v4103_v12 }
 0x19d   : > { %v3039_v21 = vld [vmem:[#allocation3 + $0xbc] sm:$0xf0]  ;;  %803 = vst [vmem:[#allocation3 + $0x108] sm:$0xf] %v767_v0  ;;  %v911_v41 = vrot.slane %v909_v63, 6  ;;  %v771_v61 = vrot.slane %v769_v20, 4  ;;  %v679_v47 = vsel %vm3937_vm3, %v4325_v53, %v678_v16  ;;  %v555_v24 = vor.u32 %v4303_v33, %v4268_v22 }
 0x19e   : > { %v3037_v28 = vld [vmem:[#allocation3 + $0x98] sm:$0xf]  ;;  %979 = vst [vmem:[#allocation3 + $0x58] sm:$0xf] %v863_v27  ;;  %v1135_v54 = vrot.slane %v4388_v42, 6  ;;  %v1260_v29 = vrot.slane %v1258_v5, 6 }
 0x19f   : > { %v3038_v17 = vor.u32 %v3494_v52, %v3037_v28  ;;  %v3490_v50 = vld [vmem:[#allocation3 + $0x9c] sm:$0xf]  ;;  %980 = vst [vmem:[#allocation3 + $0x7c] sm:$0xf] %v873_v7  ;;  %v5266_v39 = vrot.slane %v4254_v45, 5  ;;  %v772_v44 = vrot.slane %v4408_v6, 5  ;;  %v770_v45 = vsel %vm3937_vm3, %v4335_v58, %v769_v20 }
 0x1a0   : > { %v3042_v38 = vor.u32 %v3490_v50, %v3039_v21  ;;  %605 = vst [vmem:[#allocation3 + $0x4] sm:$0xf] %v471_v60  ;;  %v884_v12 = vrot.slane %v882_v40, 4  ;;  %v1263_v4 = vrot.slane %v1261_v8, 7  ;;  %v1519_v63 = vld [vmem:[#allocation3 + $0x1b0] sm:$0xff]  ;;  %v1268_v62 = vshrl.u32 %v4406_v3, 16 }
 0x1a1   : > { %v676_v15 = vsel %vm3937_vm3, %v4307_v56, %v5266_v39  ;;  %2516 = vmatmul.bf16.gmra.mxu0 %v3038_v17  ;;  %606 = vst [vmem:[#allocation3 + $0x28] sm:$0xf] %v481_v34  ;;  %v3572_v10 = vld [vmem:[#allocation4 + $0x178] sm:$0xff]  ;;  %v874_v56 = vrot.slane %v4372_v31, 4  ;;  %v1271_v14 = vshll.u32 %v4406_v3, 16  ;;  %v773_v53 = vsel %vm3937_vm3, %v771_v61, %v772_v44  ;;  %v3579_v32 = vld [vmem:[#allocation4 + $0x1b0] sm:$0xff] }
 0x1a2   : > { %710 = vst [vmem:[#allocation3 + $0x128] sm:$0xf] %v676_v15  ;;  %v3588_v23 = vld [vmem:[#allocation4 + $0x1f8] sm:$0xff]  ;;  %2627 = vmatpush.bf16.msra.mxu3 %v3572_v10  ;;  %v1845_v19 = vunpack.c.l.b16 %v1519_v63  ;;  %2671 = vmatpush.bf16.msrb.mxu0 %v3579_v32  ;;  %v893_v20 = vsel %vm4317_vm1, %v884_v12, %v4404_v51  ;;  %v894_v35 = vrot.slane %v4404_v51, 4  ;;  %v904_v46 = vrot.slane %v4414_v49, 4  ;;  %v3571_v50 = vld [vmem:[#allocation4 + $0x170] sm:$0xff] }
 0x1a3   : > { %v629_v43 = vld [vmem:[#allocation2 + $0x2c] sm:$0xf]  ;;  %v4442_v58 = vld [vmem:[#allocation2 + $0x30] sm:$0xf]  ;;  %711 = vst [vmem:[#allocation3 + $0x14c] sm:$0xf] %v679_v47  ;;  %v883_v33 = vsel %vm4317_vm1, %v874_v56, %v882_v40  ;;  %2713 = vmatpush.bf16.msra.mxu1 %v3588_v23  ;;  %v4453_v0 = vor.u32 %v1263_v4, %v1260_v29  ;;  %v491_v40 = vsel %vm4345_vm2, %v4137_v48, %v4109_v25 }
 0x1a4   : > { %v4446_v31 = vld [vmem:[#allocation2 + $0x30] sm:$0xf]  ;;  %804 = vst [vmem:[#allocation3 + $0x12c] sm:$0xf] %v770_v45  ;;  %v3477_v27 = vld [vmem:[#allocation3 + $0x30] sm:$0xf0]  ;;  %v501_v51 = vsel %vm4345_vm2, %v4147_v55, %v4020_v30  ;;  %v4466_v3 = vor.u32 %v911_v41, %v4381_v57  ;;  %v1908_v60 = vpack.c.b16 %v1845_v19, %v1845_v19 }
 0x1a5   : > { %2559 = vmatmul.bf16.gmra.mxu1 %v3042_v38  ;;  %v2973_v5 = vld [vmem:[#allocation3 + $0x10] sm:$0xf]  ;;  %805 = vst [vmem:[#allocation3 + $0x150] sm:$0xf] %v773_v53  ;;  %v4459_v8 = vrot.slane %v555_v24, 4  ;;  %v680_v52 = vrot.slane %v678_v16, 4  ;;  %v903_v16 = vsel %vm4317_vm1, %v894_v35, %v4414_v49 }
 0x1a6   : > { %v681_v7 = vrot.slane %v629_v43, 5  ;;  %981 = vst [vmem:[#allocation3 + $0xa0] sm:$0xf] %v883_v33  ;;  %v4470_v21 = vrot.slane %v1132_v2, 4  ;;  %v4474_v48 = vrot.slane %v1135_v54, 4  ;;  %v684_v30 = vrot.slane %v4442_v58, 5  ;;  %2628 = vmatpush.bf16.msra.mxu3 %v3571_v50 }
 0x1a7   : > { %v4476_v25 = vld [vmem:[#allocation2 + $0x28] sm:$0xf]  ;;  %982 = vst [vmem:[#allocation3 + $0xc4] sm:$0xf] %v893_v20  ;;  %v775_v55 = vrot.slane %v4446_v31, 5  ;;  %v2974_v57 = vor.u32 %v3477_v27, %v2973_v5  ;;  %v1266_v41 = vrot.slane %v4453_v0, 4  ;;  %v913_v34 = vsel %vm4317_vm1, %v904_v46, %v4466_v3 }
 0x1a8   : > { %607 = vst [vmem:[#allocation3 + $0x4c] sm:$0xf] %v491_v40  ;;  %v4484_v61 = vrot.slane %v1268_v62, 6  ;;  %v4486_v28 = vrot.slane %v1271_v14, 7  ;;  %v558_v49 = vshll.u32 %v4476_v25, 16  ;;  %v562_v29 = vshrl.u32 %v4476_v25, 16 }
 0x1a9   : > { %608 = vst [vmem:[#allocation3 + $0x70] sm:$0xf] %v501_v51  ;;  %v683_v17 = vrot.slane %v681_v7, 4  ;;  %v682_v39 = vsel %vm3937_vm3, %v680_v52, %v681_v7  ;;  %v818_v15 = vld [vmem:[#allocation2 + $0x28] sm:$0xf]  ;;  %v5268_v12 = vld [vmem:[#allocation16_spill] sm:$0xff] }
 0x1aa   : > { %2592 = vmatmul.bf16.vlgmr.msrb.gmra.mxu2 %v2974_v57  ;;  %983 = vst [vmem:[#allocation3 + $0xe8] sm:$0xf] %v903_v16  ;;  %v819_v38 = vld [vmem:[#allocation2 + $0x2c] sm:$0xf]  ;;  %v5267_v47 = vld [vmem:[#allocation14_spill] sm:$0xff]  ;;  %v774_v10 = vrot.slane %v772_v44, 4 }
 0x1ab   : > { %712 = vst [vmem:[#allocation3 + $0x170] sm:$0xf] %v682_v39  ;;  %v511_v4 = vsel %vm4345_vm2, %v5268_v12, %v5267_v47  ;;  %v4499_v63 = vld [vmem:[#allocation2 + $0x2c] sm:$0xf]  ;;  %v777_v45 = vrot.slane %v775_v55, 4  ;;  %v685_v24 = vsel %vm3937_vm3, %v683_v17, %v684_v30  ;;  %v5269_v62 = vld [vmem:[#allocation24_spill] sm:$0xff]  ;;  %v551_v12 = vsel %vm4345_vm2, %v4321_v1, %v4268_v22 }
 0x1ac   : > { %2450 = vmatmul.bf16.gmra.mxu3 %v1908_v60  ;;  %v3503_v56 = vld [vmem:[#allocation3 + $0x100] sm:$0xf0]  ;;  %984 = vst [vmem:[#allocation3 + $0x10c] sm:$0xf] %v913_v34  ;;  %v5270_v14 = vld [vmem:[#allocation20_spill] sm:$0xff]  ;;  %v5271_v6 = vld [vmem:[#allocation25_spill] sm:$0xff]  ;;  %v776_v52 = vsel %vm3937_vm3, %v774_v10, %v775_v55 }
 0x1ad   : > { %v521_v53 = vsel %vm4345_vm2, %v5270_v14, %v5269_v62  ;;  %v3075_v32 = vld [vmem:[#allocation3 + $0x104] sm:$0xf0]  ;;  %713 = vst [vmem:[#allocation3 + $0x194] sm:$0xf] %v685_v24  ;;  %v4511_v23 = vld [vmem:[#allocation2 + $0x34] sm:$0xf] }
 0x1ae   : > { %v5272_v44 = vld [vmem:[#allocation28_spill] sm:$0xff]  ;;  %v916_v33 = vshrl.u32 %v818_v15, 16  ;;  %v919_v31 = vshll.u32 %v818_v15, 16  ;;  %v3073_v19 = vld [vmem:[#allocation3 + $0xe0] sm:$0xf]  ;;  %v926_v20 = vshrl.u32 %v819_v38, 16 }
 0x1af   : > { %v531_v43 = vsel %vm4345_vm2, %v5272_v44, %v5271_v6  ;;  %609 = vst [vmem:[#allocation3 + $0x94] sm:$0xf] %v511_v4  ;;  %v3074_v35 = vor.u32 %v3503_v56, %v3073_v19  ;;  %v3499_v46 = vld [vmem:[#allocation3 + $0xe4] sm:$0xf]  ;;  %v778_v5 = vrot.slane %v4511_v23, 5  ;;  %v929_v27 = vshll.u32 %v819_v38, 16 }
 0x1b0   : > { %610 = vst [vmem:[#allocation3 + $0xb8] sm:$0xf] %v521_v53  ;;  %v3078_v40 = vor.u32 %v3499_v46, %v3075_v32  ;;  %v5273_v7 = vld [vmem:[#allocation29_spill] sm:$0xff]  ;;  %v4524_v16 = vrot.slane %v558_v49, 5  ;;  %v568_v57 = vshll.u32 %v4499_v63, 16  ;;  %v5274_v17 = vld [vmem:[#allocation18_spill] sm:$0xff] }
 0x1b1   : > { %v541_v51 = vsel %vm4345_vm2, %v5273_v7, %v4265_v37  ;;  %611 = vst [vmem:[#allocation3 + $0xdc] sm:$0xf] %v531_v43  ;;  %2521 = vmatmul.bf16.gmra.mxu0 %v3074_v35  ;;  %v3578_v60 = vld [vmem:[#allocation4 + $0x1a8] sm:$0xff]  ;;  %v779_v34 = vsel %vm3937_vm3, %v777_v45, %v778_v5  ;;  %v5275_v55 = vrot.slane %v5274_v17, 6  ;;  %v5276_v50 = vld [vmem:[#allocation27_spill] sm:$0xff]  ;;  %v918_v37 = vrot.slane %v916_v33, 5 }
 0x1b2   : > { %806 = vst [vmem:[#allocation3 + $0x174] sm:$0xf] %v776_v52  ;;  %v921_v38 = vrot.slane %v919_v31, 6  ;;  %v4536_v49 = vld [vmem:[#allocation4 + $0x238] sm:$0xff]  ;;  %v3587_v47 = vld [vmem:[#allocation4 + $0x1f0] sm:$0xff]  ;;  %v928_v4 = vrot.slane %v926_v20, 5  ;;  %2672 = vmatpush.bf16.msrb.mxu0 %v3578_v60  ;;  %v561_v25 = vsel %vm4345_vm2, %v4459_v8, %v4524_v16  ;;  %v4590_v8 = vor.u32 %v4486_v28, %v4484_v61 }
 0x1b3   : > { %v1121_v15 = vsel %vm3970_vm9, %v5276_v50, %v5275_v55  ;;  %807 = vst [vmem:[#allocation3 + $0x198] sm:$0xf] %v779_v34  ;;  %v820_v10 = vld [vmem:[#allocation2 + $0x30] sm:$0xf]  ;;  %v3570_v45 = vld [vmem:[#allocation4 + $0x168] sm:$0xff]  ;;  %v931_v53 = vrot.slane %v929_v27, 6  ;;  %3641 = vmatpush.bf16.msra.mxu2 %v4536_v49  ;;  %2714 = vmatpush.bf16.msra.mxu1 %v3587_v47 }
 0x1b4   : > { %612 = vst [vmem:[#allocation3 + $0x100] sm:$0xf] %v541_v51  ;;  %v5278_v56 = vld [vmem:[#allocation19_spill] sm:$0xff]  ;;  %v5280_v62 = vld [vmem:[#allocation21_spill] sm:$0xff]  ;;  %v4547_v32 = vld [vmem:[#allocation2 + $0x28] sm:$0xf]  ;;  %2629 = vmatpush.bf16.msra.mxu3 %v3570_v45  ;;  %v922_v51 = vor.u32 %v921_v38, %v918_v37 }
 0x1b5   : > { %2564 = vmatmul.bf16.gmra.mxu1 %v3078_v40  ;;  %v5279_v24 = vrot.slane %v5278_v56, 6  ;;  %v3586_v6 = vld [vmem:[#allocation4 + $0x1e8] sm:$0xff]  ;;  %1169 = vst [vmem:[#allocation3 + $0x3c] sm:$0xf] %v1121_v15  ;;  %v5281_v22 = vrot.slane %v4185_v13, 6  ;;  %v5282_v1 = vld [vmem:[#allocation22_spill] sm:$0xff] }
 0x1b6   : > { %v4555_v43 = vld [vmem:[#allocation2 + $0x28] sm:$0xf]  ;;  %v3009_v33 = vld [vmem:[#allocation3 + $0x58] sm:$0xf]  ;;  %613 = vst [vmem:[#allocation3 + $0x124] sm:$0xf] %v551_v12 }
 0x1b7   : > { %v1124_v14 = vsel %vm3970_vm9, %v5280_v62, %v5279_v24  ;;  %v1127_v44 = vsel %vm3970_vm9, %v5282_v1, %v5281_v22  ;;  %v5283_v31 = vld [vmem:[#allocation23_spill] sm:$0xff]  ;;  %v5284_v19 = vld [vmem:[#allocation12_spill] sm:$0xff]  ;;  %v936_v27 = vshrl.u32 %v820_v10, 16  ;;  %v939_v40 = vshll.u32 %v820_v10, 16  ;;  %v3486_v52 = vld [vmem:[#allocation3 + $0x78] sm:$0xf0]  ;;  %2715 = vmatpush.bf16.msra.mxu1 %v3586_v6 }
 0x1b8   : > { %v5285_v20 = vrot.slane %v5284_v19, 4  ;;  %1170 = vst [vmem:[#allocation3 + $0x60] sm:$0xf] %v1124_v14  ;;  %v5287_v13 = vrot.slane %v5283_v31, 4  ;;  %v3471_v60 = vld [vmem:[#allocation3 + $0x4] sm:$0xf]  ;;  %v3010_v50 = vor.u32 %v3486_v52, %v3009_v33  ;;  %v932_v62 = vor.u32 %v931_v53, %v928_v4 }
 0x1b9   : > { %v2959_v34 = vld [vmem:[#allocation3 + $0x24] sm:$0xf0]  ;;  %1171 = vst [vmem:[#allocation3 + $0x84] sm:$0xf] %v1127_v44  ;;  %v4569_v17 = vrot.slane %v562_v29, 4  ;;  %v572_v55 = vshrl.u32 %v4499_v63, 16 }
 0x1ba   : > { %v1235_v46 = vsel %vm3998_vm12, %v5285_v20, %v5283_v31  ;;  %v1245_v7 = vsel %vm3998_vm12, %v5287_v13, %v4243_v18  ;;  %v5288_v15 = vrot.slane %v4187_v26, 6  ;;  %v5289_v47 = vld [vmem:[#allocation32_spill] sm:$0xff]  ;;  %v1138_v37 = vrot.slane %v4547_v32, 6  ;;  %2597 = vmatmul.bf16.gmra.mxu2 %v3010_v50  ;;  %614 = vst [vmem:[#allocation3 + $0x148] sm:$0xf] %v561_v25  ;;  %v5290_v23 = vld [vmem:[#allocation33_spill] sm:$0xff] }
 0x1bb   : > { %1351 = vst [vmem:[#allocation3 + $0x64] sm:$0xf] %v1235_v46  ;;  %v1278_v38 = vshrl.u32 %v4555_v43, 16  ;;  %v914_v10 = vrot.slane %v4466_v3, 4  ;;  %v938_v29 = vrot.slane %v936_v27, 5  ;;  %v941_v45 = vrot.slane %v939_v40, 6 }
 0x1bc   : > { %v1130_v12 = vsel %vm3970_vm9, %v5289_v47, %v5288_v15  ;;  %1352 = vst [vmem:[#allocation3 + $0x88] sm:$0xf] %v1245_v7  ;;  %v2962_v26 = vor.u32 %v3471_v60, %v2959_v34  ;;  %v3577_v56 = vld [vmem:[#allocation4 + $0x1a0] sm:$0xff]  ;;  %v686_v14 = vrot.slane %v684_v30, 4  ;;  %v3109_v6 = vld [vmem:[#allocation3 + $0x128] sm:$0xf]  ;;  %v565_v30 = vor.u32 %v4569_v17, %v4524_v16 }
 0x1bd   : > { %v3585_v24 = vld [vmem:[#allocation4 + $0x1e0] sm:$0xff]  ;;  %v3512_v22 = vld [vmem:[#allocation3 + $0x148] sm:$0xf0]  ;;  %v923_v3 = vsel %vm4317_vm1, %v914_v10, %v922_v51  ;;  %v924_v1 = vrot.slane %v922_v51, 4  ;;  %1172 = vst [vmem:[#allocation3 + $0xa8] sm:$0xf] %v1130_v12  ;;  %2673 = vmatpush.bf16.msrb.mxu0 %v3577_v56 }
 0x1be   : > { %v1281_v44 = vshll.u32 %v4555_v43, 16  ;;  %2463 = vmatmul.bf16.vlgmr.msrb.gmra.mxu3 %v2962_v26  ;;  %v631_v33 = vld [vmem:[#allocation2 + $0x34] sm:$0x1]  ;;  %v728_v4 = vld [vmem:[#allocation2 + $0x38] sm:$0x1]  ;;  %v780_v58 = vrot.slane %v778_v5, 4  ;;  %2716 = vmatpush.bf16.msra.mxu1 %v3585_v24  ;;  %v942_v43 = vor.u32 %v941_v45, %v938_v29  ;;  %v3110_v20 = vor.u32 %v3512_v22, %v3109_v6 }
 0x1bf   : > { %v3111_v53 = vld [vmem:[#allocation3 + $0x14c] sm:$0xf0]  ;;  %v687_v31 = vrot.slane %v631_v33, 5  ;;  %v781_v19 = vrot.slane %v728_v4, 5  ;;  %v933_v61 = vsel %vm4317_vm1, %v924_v1, %v932_v62  ;;  %985 = vst [vmem:[#allocation3 + $0x130] sm:$0xf] %v923_v3  ;;  %v1133_v5 = vsel %vm3970_vm9, %v5290_v23, %v1132_v2 }
 0x1c0   : > { %v1280_v28 = vrot.slane %v1278_v38, 6  ;;  %986 = vst [vmem:[#allocation3 + $0x154] sm:$0xf] %v933_v61  ;;  %v821_v46 = vld [vmem:[#allocation2 + $0x34] sm:$0xf]  ;;  %v1283_v51 = vrot.slane %v1281_v44, 7  ;;  %v1136_v1 = vsel %vm3970_vm9, %v4470_v21, %v1135_v54  ;;  %v1275_v54 = vsel %vm3998_vm12, %v1266_v41, %v4590_v8 }
 0x1c1   : > { %v3508_v16 = vld [vmem:[#allocation3 + $0x12c] sm:$0xf]  ;;  %v688_v27 = vsel %vm3937_vm3, %v686_v14, %v687_v31  ;;  %v782_v40 = vsel %vm3937_vm3, %v780_v58, %v781_v19  ;;  %v946_v52 = vshrl.u32 %v821_v46, 16  ;;  %v949_v13 = vshll.u32 %v821_v46, 16  ;;  %2526 = vmatmul.bf16.gmra.mxu0 %v3110_v20  ;;  %v4615_v50 = vld [vmem:[#allocation4 + $0x230] sm:$0xff]  ;;  %v3569_v24 = vld [vmem:[#allocation4 + $0x160] sm:$0xff] }
 0x1c2   : > { %v4608_v7 = vld [vmem:[#allocation2 + $0x2c] sm:$0xf]  ;;  %v3114_v60 = vor.u32 %v3508_v16, %v3111_v53  ;;  %714 = vst [vmem:[#allocation3 + $0x1b8] sm:$0xf] %v688_v27  ;;  %v934_v34 = vrot.slane %v932_v62, 4  ;;  %v5292_v17 = vrot.slane %v4243_v18, 4  ;;  %3642 = vmatpush.bf16.msra.mxu2 %v4615_v50  ;;  %2674 = vmatpush.bf16.msrb.mxu0 %v3576_v36  ;;  %v4640_v14 = vor.u32 %v1283_v51, %v1280_v28 }
 0x1c3   : > { %v5291_v9 = vld [vmem:[#allocation35_spill] sm:$0xff]  ;;  %808 = vst [vmem:[#allocation3 + $0x1bc] sm:$0xf] %v782_v40  ;;  %v948_v15 = vrot.slane %v946_v52, 5  ;;  %v951_v47 = vrot.slane %v949_v13, 6  ;;  %v1276_v12 = vrot.slane %v4590_v8, 4  ;;  %2630 = vmatpush.bf16.msra.mxu3 %v3569_v24  ;;  %v1139_v58 = vsel %vm3970_vm9, %v4474_v48, %v1138_v37 }
 0x1c4   : > { %v1255_v2 = vsel %vm3998_vm12, %v5292_v17, %v5291_v9  ;;  %v4618_v38 = vld [vmem:[#allocation2 + $0x20] sm:$0xf]  ;;  %v4622_v10 = vrot.slane %v568_v57, 5  ;;  %v574_v18 = vrot.slane %v572_v55, 4  ;;  %v3584_v25 = vld [vmem:[#allocation4 + $0x1d8] sm:$0xff]  ;;  %v5293_v29 = vrot.slane %v5291_v9, 4 }
 0x1c5   : > { %2569 = vmatmul.bf16.gmra.mxu1 %v3114_v60  ;;  %1173 = vst [vmem:[#allocation3 + $0xcc] sm:$0xf] %v1133_v5  ;;  %v4631_v26 = vld [vmem:[#allocation2 + $0x24] sm:$0xf]  ;;  %v4633_v56 = vrot.slane %v565_v30, 4  ;;  %v943_v63 = vsel %vm4317_vm1, %v934_v34, %v942_v43  ;;  %v944_v55 = vrot.slane %v942_v43, 4  ;;  %v4638_v62 = vor.u32 %v951_v47, %v948_v15 }
 0x1c6   : > { %v1265_v45 = vsel %vm3998_vm12, %v5293_v29, %v4453_v0  ;;  %v3575_v57 = vld [vmem:[#allocation4 + $0x190] sm:$0xff]  ;;  %1353 = vst [vmem:[#allocation3 + $0xac] sm:$0xf] %v1255_v2  ;;  %v1288_v6 = vshrl.u32 %v4608_v7, 16  ;;  %v1291_v22 = vshll.u32 %v4608_v7, 16  ;;  %2717 = vmatpush.bf16.msra.mxu1 %v3584_v25  ;;  %v1410_v21 = vrot.slane %v4618_v38, 7 }
 0x1c7   : > { %v3583_v3 = vld [vmem:[#allocation4 + $0x1d0] sm:$0xff]  ;;  %987 = vst [vmem:[#allocation3 + $0x178] sm:$0xf] %v943_v63  ;;  %v1191_v44 = vld [vmem:[#allocation2 + $0x30] sm:$0xf]  ;;  %v953_v4 = vsel %vm4317_vm1, %v944_v55, %v4638_v62  ;;  %v575_v31 = vor.u32 %v574_v18, %v4622_v10  ;;  %2675 = vmatpush.bf16.msrb.mxu0 %v3575_v57  ;;  %v3574_v61 = vld [vmem:[#allocation4 + $0x188] sm:$0xff]  ;;  %v1285_v0 = vsel %vm3998_vm12, %v1276_v12, %v4640_v14 }
 0x1c8   : > { %v3495_v33 = vld [vmem:[#allocation3 + $0xc0] sm:$0xf0]  ;;  %1354 = vst [vmem:[#allocation3 + $0xd0] sm:$0xf] %v1265_v45  ;;  %v4657_v30 = vld [vmem:[#allocation2 + $0x2c] sm:$0xf]  ;;  %v571_v52 = vsel %vm4345_vm2, %v4633_v56, %v4622_v10 }
 0x1c9   : > { %v3045_v42 = vld [vmem:[#allocation3 + $0xa0] sm:$0xf]  ;;  %v3480_v53 = vld [vmem:[#allocation3 + $0x4c] sm:$0xf]  ;;  %988 = vst [vmem:[#allocation3 + $0x19c] sm:$0xf] %v953_v4 }
 0x1ca   : > { %v2995_v19 = vld [vmem:[#allocation3 + $0x6c] sm:$0xf0]  ;;  %1174 = vst [vmem:[#allocation3 + $0xf0] sm:$0xf] %v1136_v1  ;;  %v1413_v48 = vrot.slane %v4631_v26, 7  ;;  %v3046_v43 = vor.u32 %v3495_v33, %v3045_v42  ;;  %2718 = vmatpush.bf16.msra.mxu1 %v3583_v3  ;;  %v3582_v20 = vld [vmem:[#allocation4 + $0x1c8] sm:$0xff] }
 0x1cb   : > { %v4667_v28 = vld [vmem:[#allocation2 + $0x28] sm:$0xf]  ;;  %1175 = vst [vmem:[#allocation3 + $0x114] sm:$0xf] %v1139_v58  ;;  %v1140_v41 = vrot.slane %v1138_v37, 4  ;;  %v1290_v8 = vrot.slane %v1288_v6, 6  ;;  %v2998_v27 = vor.u32 %v3480_v53, %v2995_v19  ;;  %2676 = vmatpush.bf16.msrb.mxu0 %v3574_v61 }
 0x1cc   : > { %v1293_v46 = vrot.slane %v1291_v22, 7  ;;  %v1298_v23 = vshrl.u32 %v1191_v44, 16  ;;  %1355 = vst [vmem:[#allocation3 + $0xf4] sm:$0xf] %v1275_v54  ;;  %v4674_v5 = vld [vmem:[#allocation2 + $0x30] sm:$0xf]  ;;  %2602 = vmatmul.bf16.gmra.mxu2 %v3046_v43 }
 0x1cd   : > { %v1301_v16 = vshll.u32 %v1191_v44, 16  ;;  %v4676_v40 = vld [vmem:[#allocation4 + $0x228] sm:$0xff]  ;;  %1356 = vst [vmem:[#allocation3 + $0x118] sm:$0xf] %v1285_v0  ;;  %v5294_v13 = vld [vmem:[#allocation31_spill] sm:$0xff]  ;;  %v5296_v37 = vld [vmem:[#allocation34_spill] sm:$0xff] }
 0x1ce   : > { %v5295_v32 = vrot.slane %v5294_v13, 7  ;;  %v4687_v60 = vld [vmem:[#allocation2 + $0x20] sm:$0xf]  ;;  %v1412_v34 = vrot.slane %v1410_v21, 4  ;;  %v576_v9 = vrot.slane %v575_v31, 4  ;;  %v1141_v17 = vrot.slane %v4657_v30, 6  ;;  %2468 = vmatmul.bf16.gmra.mxu3 %v2998_v27  ;;  %2719 = vmatpush.bf16.msra.mxu1 %v3582_v20 }
 0x1cf   : > { %v3573_v2 = vld [vmem:[#allocation4 + $0x180] sm:$0xff]  ;;  %v4693_v47 = vld [vmem:[#allocation2 + $0x1c] sm:$0xf]  ;;  %v1286_v12 = vrot.slane %v4640_v14, 4  ;;  %615 = vst [vmem:[#allocation3 + $0x16c] sm:$0xf] %v571_v52  ;;  %3643 = vmatpush.bf16.msra.mxu2 %v4676_v40  ;;  %v1294_v26 = vor.u32 %v1293_v46, %v1290_v8 }
 0x1d0   : > { %v1408_v51 = vsel %vm3948_vm6, %v5296_v37, %v5295_v32  ;;  %v5298_v36 = vld [vmem:[#allocation36_spill] sm:$0xff]  ;;  %v1416_v18 = vrot.slane %v4667_v28, 7  ;;  %v1144_v25 = vrot.slane %v4674_v5, 6  ;;  %v1142_v45 = vsel %vm3970_vm9, %v1140_v41, %v1141_v17  ;;  %v3145_v24 = vld [vmem:[#allocation3 + $0x170] sm:$0xf]  ;;  %v5299_v63 = vld [vmem:[#allocation37_spill] sm:$0xff]  ;;  %2677 = vmatpush.bf16.msrb.mxu0 %v3573_v2 }
 0x1d1   : > { %v1411_v15 = vsel %vm3948_vm6, %v5298_v36, %v1410_v21  ;;  %v3521_v38 = vld [vmem:[#allocation3 + $0x190] sm:$0xf0]  ;;  %v3147_v29 = vld [vmem:[#allocation3 + $0x194] sm:$0xf0]  ;;  %1450 = vst [vmem:[#allocation3 + $0xb0] sm:$0xf] %v1408_v51  ;;  %v581_v55 = vsel %vm4345_vm2, %v576_v9, %v5299_v63  ;;  %v1414_v33 = vsel %vm3948_vm6, %v1412_v34, %v1413_v48  ;;  %v1295_v59 = vsel %vm3998_vm12, %v1286_v12, %v1294_v26 }
 0x1d2   : > { %v3581_v10 = vld [vmem:[#allocation4 + $0x1c0] sm:$0xff]  ;;  %v1300_v56 = vrot.slane %v1298_v23, 6  ;;  %v1303_v57 = vrot.slane %v1301_v16, 7  ;;  %1451 = vst [vmem:[#allocation3 + $0xd4] sm:$0xf] %v1411_v15  ;;  %v5300_v14 = vld [vmem:[#allocation15_spill] sm:$0xff]  ;;  %v3146_v1 = vor.u32 %v3521_v38, %v3145_v24 }
 0x1d3   : > { %v5301_v6 = vrot.slane %v5300_v14, 6  ;;  %v1415_v3 = vrot.slane %v1413_v48, 4  ;;  %v3517_v44 = vld [vmem:[#allocation3 + $0x174] sm:$0xf]  ;;  %616 = vst [vmem:[#allocation3 + $0x190] sm:$0xf] %v581_v55  ;;  %2720 = vmatpush.bf16.msra.mxu1 %v3581_v10 }
 0x1d4   : > { %v1041_v4 = vrot.slane %v4687_v60, 6  ;;  %v1143_v58 = vrot.slane %v1141_v17, 4  ;;  %v3150_v30 = vor.u32 %v3517_v44, %v3147_v29  ;;  %2756 = vmatpush.bf16.msra.mxu0 %v4536_v49  ;;  %1176 = vst [vmem:[#allocation3 + $0x138] sm:$0xf] %v1142_v45  ;;  %v1038_v42 = vrot.slane %v4693_v47, 6  ;;  %v5302_v54 = vld [vmem:[#allocation30_spill] sm:$0xff] }
 0x1d5   : > { %v1031_v22 = vrot.slane %v5301_v6, 4  ;;  %2531 = vmatmul.bf16.gmra.mxu0 %v3146_v1  ;;  %1357 = vst [vmem:[#allocation3 + $0x13c] sm:$0xf] %v1295_v59  ;;  %v1417_v53 = vsel %vm3948_vm6, %v1415_v3, %v1416_v18  ;;  %v5303_v21 = vrot.slane %v5302_v54, 6  ;;  %v4719_v19 = vor.u32 %v1303_v57, %v1300_v56  ;;  %v3568_v49 = vld [vmem:[#allocation4 + $0x158] sm:$0xff]  ;;  %v3593_v61 = vld [vmem:[#allocation4 + $0x220] sm:$0xff] }
 0x1d6   : > { %2574 = vmatmul.bf16.gmra.mxu1 %v3150_v30  ;;  %v1145_v48 = vsel %vm3970_vm9, %v1143_v58, %v1144_v25  ;;  %1452 = vst [vmem:[#allocation3 + $0xf8] sm:$0xf] %v1414_v33  ;;  %v5304_v43 = vmov %v5301_v6  ;;  %v5305_v20 = vld [vmem:[#allocation26_spill] sm:$0xff]  ;;  %v5306_v41 = vld [vmem:[#allocation17_spill] sm:$0xff]  ;;  %v1043_v52 = vrot.slane %v1041_v4, 4  ;;  %v1296_v13 = vrot.slane %v1294_v26, 4  ;;  %2631 = vmatpush.bf16.msra.mxu3 %v3568_v49 }
 0x1d7   : > { %v1037_v31 = vrot.slane %v5303_v21, 4  ;;  %v1030_v0 = vsel %vm3970_vm9, %v5305_v20, %v5304_v43  ;;  %v5307_v8 = vrot.slane %v5306_v41, 6  ;;  %v998_v23 = vld [vmem:[#allocation2 + $0x24] sm:$0xf]  ;;  %1177 = vst [vmem:[#allocation3 + $0x15c] sm:$0xf] %v1145_v48  ;;  %3644 = vmatpush.bf16.msra.mxu2 %v3593_v61  ;;  %v5309_v51 = vmov %v5303_v21 }
 0x1d8   : > { %1453 = vst [vmem:[#allocation3 + $0x11c] sm:$0xf] %v1417_v53  ;;  %v1040_v32 = vrot.slane %v1038_v42, 4  ;;  %v3504_v37 = vld [vmem:[#allocation3 + $0x108] sm:$0xf0]  ;;  %2757 = vmatpush.bf16.msra.mxu0 %v4615_v50  ;;  %v1044_v34 = vrot.slane %v998_v23, 6  ;;  %v1305_v9 = vsel %vm3998_vm12, %v1296_v13, %v4719_v19 }
 0x1d9   : > { %v1034_v46 = vrot.slane %v5307_v8, 4  ;;  %v5308_v16 = vmov %v5307_v8  ;;  %1076 = vst [vmem:[#allocation3 + $0x5c] sm:$0xf] %v1030_v0  ;;  %v1039_v17 = vsel %vm3970_vm9, %v1037_v31, %v1038_v42  ;;  %v3081_v2 = vld [vmem:[#allocation3 + $0xe8] sm:$0xf]  ;;  %v1520_v47 = vld [vmem:[#allocation3 + $0x1b8] sm:$0xff] }
 0x1da   : > { %v1033_v27 = vsel %vm3970_vm9, %v1031_v22, %v5308_v16  ;;  %v3031_v36 = vld [vmem:[#allocation3 + $0xb4] sm:$0xf0]  ;;  %1358 = vst [vmem:[#allocation3 + $0x160] sm:$0xf] %v1305_v9  ;;  %v1042_v50 = vsel %vm3970_vm9, %v1040_v32, %v1041_v4  ;;  %v3082_v15 = vor.u32 %v3504_v37, %v3081_v2  ;;  %v1045_v12 = vsel %vm3970_vm9, %v1043_v52, %v1044_v34  ;;  %v3489_v38 = vld [vmem:[#allocation3 + $0x94] sm:$0xf] }
 0x1db   : > { %v1036_v60 = vsel %vm3970_vm9, %v1034_v46, %v5309_v51  ;;  %1077 = vst [vmem:[#allocation3 + $0x80] sm:$0xf] %v1033_v27  ;;  %v999_v10 = vld [vmem:[#allocation2 + $0x28] sm:$0xf]  ;;  %v3034_v29 = vor.u32 %v3489_v38, %v3031_v36  ;;  %v1847_v45 = vunpack.c.l.b16 %v1520_v47  ;;  %v1848_v26 = vunpack.c.h.b16 %v1520_v47  ;;  %v1371_v57 = vld [vmem:[#allocation2 + $0x2c] sm:$0xf] }
 0x1dc   : > { %1078 = vst [vmem:[#allocation3 + $0xa4] sm:$0xf] %v1036_v60  ;;  %2758 = vmatpush.bf16.msra.mxu0 %v4676_v40  ;;  %2607 = vmatmul.bf16.gmra.mxu2 %v3082_v15  ;;  %v1047_v56 = vrot.slane %v999_v10, 6  ;;  %v4751_v24 = vld [vmem:[#allocation2 + $0x30] sm:$0xf]  ;;  %v1046_v6 = vrot.slane %v1044_v34, 4  ;;  %v4757_v3 = vpop.f32.mrf.mxu2 }
 0x1dd   : > { %1079 = vst [vmem:[#allocation3 + $0xc8] sm:$0xf] %v1039_v17  ;;  %v1910_v63 = vpack.c.b16 %v1847_v45, %v1847_v45  ;;  %v4753_v55 = vld [vmem:[#allocation2 + $0x2c] sm:$0xf]  ;;  %v1911_v14 = vpack.c.b16 %v1848_v26, %v1848_v26  ;;  %v1418_v22 = vrot.slane %v1416_v18, 4  ;;  %v1419_v1 = vrot.slane %v1371_v57, 7 }
 0x1de   : > { %1080 = vst [vmem:[#allocation3 + $0xec] sm:$0xf] %v1042_v50  ;;  %2473 = vmatmul.bf16.gmra.mxu3 %v3034_v29  ;;  %v1049_v40 = vrot.slane %v1047_v56, 4  ;;  %v1053_v44 = vrot.slane %v4751_v24, 6  ;;  %v1372_v33 = vld [vmem:[#allocation2 + $0x30] sm:$0xf]  ;;  %v1048_v59 = vsel %vm3970_vm9, %v1046_v6, %v1047_v56 }
 0x1df   : > { %1081 = vst [vmem:[#allocation3 + $0x110] sm:$0xf] %v1045_v12  ;;  %v3567_v4 = vld [vmem:[#allocation4 + $0x150] sm:$0xff]  ;;  %v3592_v58 = vld [vmem:[#allocation4 + $0x218] sm:$0xff]  ;;  %v1050_v30 = vrot.slane %v4753_v55, 6  ;;  %v1422_v28 = vrot.slane %v1372_v33, 7  ;;  %v1420_v42 = vsel %vm3948_vm6, %v1418_v22, %v1419_v1 }
 0x1e0   : > { %2759 = vmatpush.bf16.msra.mxu0 %v3593_v61  ;;  %2632 = vmatpush.bf16.msra.mxu3 %v3567_v4  ;;  %1082 = vst [vmem:[#allocation3 + $0x134] sm:$0xf] %v1048_v59  ;;  %v3513_v18 = vld [vmem:[#allocation3 + $0x150] sm:$0xf0]  ;;  %v1421_v54 = vrot.slane %v1419_v1, 4  ;;  %v4771_v21 = vrot.slane %v1053_v44, 4 }
 0x1e1   : > { %3645 = vmatpush.bf16.msra.mxu2 %v3592_v58  ;;  %v1051_v53 = vsel %vm3970_vm9, %v1049_v40, %v1050_v30  ;;  %v1146_v31 = vrot.slane %v1144_v25, 4  ;;  %1454 = vst [vmem:[#allocation3 + $0x140] sm:$0xf] %v1420_v42  ;;  %v3117_v49 = vld [vmem:[#allocation3 + $0x130] sm:$0xf]  ;;  %v1424_v23 = vrot.slane %v1422_v28, 4 }
 0x1e2   : > { %v3498_v61 = vld [vmem:[#allocation3 + $0xdc] sm:$0xf]  ;;  %v3067_v48 = vld [vmem:[#allocation3 + $0xfc] sm:$0xf0]  ;;  %1083 = vst [vmem:[#allocation3 + $0x158] sm:$0xf] %v1051_v53  ;;  %v3118_v43 = vor.u32 %v3513_v18, %v3117_v49 }
 0x1e3   : > { %v3474_v20 = vld [vmem:[#allocation3 + $0x1c] sm:$0xf]  ;;  %v2983_v0 = vld [vmem:[#allocation3 + $0x3c] sm:$0xf0]  ;;  %v1098_v41 = vld [vmem:[#allocation2 + $0x34] sm:$0xf]  ;;  %v3070_v25 = vor.u32 %v3498_v61, %v3067_v48 }
 0x1e4   : > { %2760 = vmatpush.bf16.msra.mxu0 %v3592_v58  ;;  %v1192_v8 = vld [vmem:[#allocation2 + $0x34] sm:$0xf]  ;;  %v2981_v16 = vld [vmem:[#allocation3 + $0x18] sm:$0xf]  ;;  %v1147_v52 = vrot.slane %v1098_v41, 6  ;;  %v1306_v5 = vrot.slane %v4719_v19, 4  ;;  %v4780_v9 = vpop.f32.mrf.mxu2  ;;  %v1423_v19 = vsel %vm3948_vm6, %v1421_v54, %v1422_v28  ;;  %v2986_v38 = vor.u32 %v3474_v20, %v2983_v0 }
 0x1e5   : > { %2536 = vmatmul.bf16.gmra.mxu0 %v1910_v63  ;;  %v1373_v46 = vld [vmem:[#allocation2 + $0x34] sm:$0xf]  ;;  %v1308_v13 = vshrl.u32 %v1192_v8, 16  ;;  %v1311_v32 = vshll.u32 %v1192_v8, 16  ;;  %v4778_v37 = vld [vmem:[#allocation2 + $0x38] sm:$0xf] }
 0x1e6   : > { %2579 = vmatmul.bf16.gmra.mxu1 %v1911_v14  ;;  %v4775_v27 = vld [vmem:[#allocation2 + $0x34] sm:$0xf]  ;;  %v1193_v51 = vld [vmem:[#allocation2 + $0x38] sm:$0xf]  ;;  %v1425_v60 = vrot.slane %v1373_v46, 7  ;;  %v1149_v17 = vrot.slane %v1147_v52, 4  ;;  %v1148_v10 = vsel %vm3970_vm9, %v1146_v31, %v1147_v52 }
 0x1e7   : > { %v3478_v34 = vld [vmem:[#allocation3 + $0x38] sm:$0xf0]  ;;  %v1150_v2 = vrot.slane %v4778_v37, 6  ;;  %v1310_v36 = vrot.slane %v1308_v13, 6  ;;  %v1313_v50 = vrot.slane %v1311_v32, 7  ;;  %v1056_v15 = vrot.slane %v4775_v27, 6  ;;  %v4824_v13 = vpop.f32.mrf.mxu0 }
 0x1e8   : > { %v1318_v47 = vshrl.u32 %v1193_v51, 16  ;;  %v1321_v12 = vshll.u32 %v1193_v51, 16  ;;  %1455 = vst [vmem:[#allocation3 + $0x164] sm:$0xf] %v1423_v19  ;;  %v4792_v26 = vld [vmem:[#allocation2 + $0x38] sm:$0xf]  ;;  %v2982_v56 = vor.u32 %v3478_v34, %v2981_v16  ;;  %v1426_v6 = vsel %vm3948_vm6, %v1424_v23, %v1425_v60 }
 0x1e9   : > { %v1151_v29 = vsel %vm3970_vm9, %v1149_v17, %v1150_v2  ;;  %v1314_v45 = vor.u32 %v1313_v50, %v1310_v36  ;;  %v822_v57 = vld [vmem:[#allocation2 + $0x38] sm:$0x3]  ;;  %v1058_v14 = vrot.slane %v1056_v15, 4  ;;  %v1427_v40 = vrot.slane %v1425_v60, 4  ;;  %1178 = vst [vmem:[#allocation3 + $0x180] sm:$0xf] %v1148_v10 }
 0x1ea   : > { %v1003_v63 = vld [vmem:[#allocation2 + $0x38] sm:$0x3]  ;;  %v954_v22 = vrot.slane %v4638_v62, 4  ;;  %v956_v1 = vshrl.u32 %v822_v57, 16  ;;  %v959_v33 = vshll.u32 %v822_v57, 16  ;;  %v1320_v59 = vrot.slane %v1318_v47, 6 }
 0x1eb   : > { %v1059_v4 = vrot.slane %v1003_v63, 6  ;;  %1179 = vst [vmem:[#allocation3 + $0x1a4] sm:$0xf] %v1151_v29  ;;  %v1316_v58 = vrot.slane %v1314_v45, 4  ;;  %v1323_v28 = vrot.slane %v1321_v12, 7  ;;  %v1428_v18 = vrot.slane %v4792_v26, 7 }
 0x1ec   : > { %2612 = vmatmul.bf16.gmra.mxu2 %v3118_v43  ;;  %v958_v42 = vrot.slane %v956_v1, 5  ;;  %v961_v53 = vrot.slane %v959_v33, 6  ;;  %v1315_v31 = vsel %vm3998_vm12, %v1306_v5, %v1314_v45  ;;  %1456 = vst [vmem:[#allocation3 + $0x188] sm:$0xf] %v1426_v6  ;;  %v1052_v62 = vrot.slane %v1050_v30, 4  ;;  %v3591_v49 = vld [vmem:[#allocation4 + $0x210] sm:$0xff] }
 0x1ed   : > { %v1060_v54 = vsel %vm3970_vm9, %v1058_v14, %v1059_v4  ;;  %v3566_v61 = vld [vmem:[#allocation4 + $0x148] sm:$0xff]  ;;  %v4804_v48 = vor.u32 %v1323_v28, %v1320_v59  ;;  %v1429_v43 = vsel %vm3948_vm6, %v1427_v40, %v1428_v18  ;;  %1359 = vst [vmem:[#allocation3 + $0x184] sm:$0xf] %v1315_v31  ;;  %3646 = vmatpush.bf16.msra.mxu2 %v3591_v49  ;;  %v3153_v16 = vld [vmem:[#allocation3 + $0x178] sm:$0xf] }
 0x1ee   : > { %2478 = vmatmul.bf16.gmra.mxu3 %v3070_v25  ;;  %1086 = vst [vmem:[#allocation3 + $0x1c4] sm:$0xf] %v1060_v54  ;;  %v962_v20 = vor.u32 %v961_v53, %v958_v42  ;;  %v1054_v30 = vsel %vm3970_vm9, %v1052_v62, %v1053_v44  ;;  %v3522_v0 = vld [vmem:[#allocation3 + $0x198] sm:$0xf0]  ;;  %2761 = vmatpush.bf16.msra.mxu0 %v3591_v49  ;;  %v3103_v27 = vld [vmem:[#allocation3 + $0x144] sm:$0xf0] }
 0x1ef   : > { %2633 = vmatpush.bf16.msra.mxu3 %v3566_v61  ;;  %v1325_v55 = vsel %vm3998_vm12, %v1316_v58, %v4804_v48  ;;  %1457 = vst [vmem:[#allocation3 + $0x1ac] sm:$0xf] %v1429_v43  ;;  %v1057_v46 = vsel %vm3970_vm9, %v4771_v21, %v1056_v15  ;;  %v3590_v23 = vld [vmem:[#allocation4 + $0x208] sm:$0xff]  ;;  %v3154_v24 = vor.u32 %v3522_v0, %v3153_v16  ;;  %v3589_v44 = vld [vmem:[#allocation4 + $0x200] sm:$0xff]  ;;  %v3507_v52 = vld [vmem:[#allocation3 + $0x124] sm:$0xf]  ;;  %v4826_v32 = vpop.f32.mrf.mxu1  ;;  %v4833_v47 = vpop.f32.mrf.mxu0 }
 0x1f0   : > { %v963_v8 = vsel %vm4317_vm1, %v954_v22, %v962_v20  ;;  %1360 = vst [vmem:[#allocation3 + $0x1a8] sm:$0xf] %v1325_v55  ;;  %v3106_v11 = vor.u32 %v3507_v52, %v3103_v27  ;;  %v3487_v5 = vld [vmem:[#allocation3 + $0x80] sm:$0xf0]  ;;  %v3019_v21 = vld [vmem:[#allocation3 + $0x84] sm:$0xf0] }
 0x1f1   : > { %989 = vst [vmem:[#allocation3 + $0x1c0] sm:$0xf] %v963_v8  ;;  %3647 = vmatpush.bf16.msra.mxu2 %v3590_v23  ;;  %v3017_v25 = vld [vmem:[#allocation3 + $0x60] sm:$0xf]  ;;  %v3483_v60 = vld [vmem:[#allocation3 + $0x64] sm:$0xf] }
 0x1f2   : > { %1084 = vst [vmem:[#allocation3 + $0x17c] sm:$0xf] %v1054_v30  ;;  %2762 = vmatpush.bf16.msra.mxu0 %v3590_v23  ;;  %v3018_v51 = vor.u32 %v3487_v5, %v3017_v25  ;;  %v3022_v36 = vor.u32 %v3483_v60, %v3019_v21  ;;  %v3565_v50 = vld [vmem:[#allocation4 + $0x140] sm:$0xff]  ;;  %v3516_v29 = vld [vmem:[#allocation3 + $0x16c] sm:$0xf] }
 0x1f3   : > { %v4817_v41 = vpop.f32.mrf.mxu2  ;;  %1085 = vst [vmem:[#allocation3 + $0x1a0] sm:$0xf] %v1057_v46  ;;  %2634 = vmatpush.bf16.msra.mxu3 %v3565_v50  ;;  %v3496_v57 = vld [vmem:[#allocation3 + $0xc8] sm:$0xf0]  ;;  %v3055_v63 = vld [vmem:[#allocation3 + $0xcc] sm:$0xf0] }
 0x1f4   : > { %v3053_v6 = vld [vmem:[#allocation3 + $0xa8] sm:$0xf]  ;;  %v3492_v1 = vld [vmem:[#allocation3 + $0xac] sm:$0xf]  ;;  %v3707_v42 = vld [vmem:[#allocation3 + $0x1b0] sm:$0xff] }
 0x1f5   : > { %2678 = vmatmul.bf16.vlgmr.msrb.gmra.mxu0 %v2982_v56  ;;  %3648 = vmatpush.bf16.msra.mxu2 %v3589_v44  ;;  %v3054_v22 = vor.u32 %v3496_v57, %v3053_v6  ;;  %v3058_v33 = vor.u32 %v3492_v1, %v3055_v63  ;;  %v3488_v59 = vld [vmem:[#allocation3 + $0x88] sm:$0xf0]  ;;  %v1846_v53 = vunpack.c.h.b16 %v3707_v42  ;;  %v3025_v31 = vld [vmem:[#allocation3 + $0x68] sm:$0xf]  ;;  %v3505_v61 = vld [vmem:[#allocation3 + $0x110] sm:$0xf0] }
 0x1f6   : > { %2721 = vmatmul.bf16.vlgmr.msra.gmra.mxu1 %v2986_v38  ;;  %2763 = vmatpush.bf16.msra.mxu0 %v3589_v44  ;;  %v3139_v38 = vld [vmem:[#allocation3 + $0x18c] sm:$0xf0]  ;;  %v3026_v62 = vor.u32 %v3488_v59, %v3025_v31  ;;  %v3091_v20 = vld [vmem:[#allocation3 + $0x114] sm:$0xf0]  ;;  %v3501_v23 = vld [vmem:[#allocation3 + $0xf4] sm:$0xf] }
 0x1f7   : > { %v4835_v12 = vpop.f32.mrf.mxu1  ;;  %v3142_v45 = vor.u32 %v3516_v29, %v3139_v38  ;;  %v1909_v49 = vpack.c.b16 %v1846_v53, %v1846_v53  ;;  %v3089_v30 = vld [vmem:[#allocation3 + $0xf0] sm:$0xf]  ;;  %v3094_v16 = vor.u32 %v3501_v23, %v3091_v20  ;;  %v3473_v21 = vld [vmem:[#allocation3 + $0x14] sm:$0xf]  ;;  %v2975_v25 = vld [vmem:[#allocation3 + $0x34] sm:$0xf0] }
 0x1f8   : > { %v4830_v17 = vld [vmem:[#allocation3 + $0x1c0] sm:$0xff]  ;;  %v3090_v46 = vor.u32 %v3505_v61, %v3089_v30  ;;  %v3061_v5 = vld [vmem:[#allocation3 + $0xb0] sm:$0xf]  ;;  %v2978_v60 = vor.u32 %v3473_v21, %v2975_v25  ;;  %v3125_v38 = vld [vmem:[#allocation3 + $0x138] sm:$0xf] }
 0x1f9   : > { %v1849_v15 = vunpack.c.l.b16 %v4830_v17  ;;  %v3510_v29 = vld [vmem:[#allocation3 + $0x13c] sm:$0xf]  ;;  %v4893_v21 = vld [vmem:[%s5157_s4] ss:$0 sm:$0xff] }
 0x1fa   : > { %v1100_v6 = vld [vmem:[#allocation2 + $0x3c] sm:$0x3] }
 0x1fb   : > { %v4828_v34 = vpop.f32.mrf.mxu2  ;;  %v1912_v19 = vpack.c.b16 %v1849_v15, %v1849_v15  ;;  %v3127_v15 = vld [vmem:[#allocation3 + $0x15c] sm:$0xf0]  ;;  %v1194_v1 = vld [vmem:[#allocation2 + $0x3c] sm:$0x7]  ;;  %v1153_v59 = vrot.slane %v1100_v6, 6 }
 0x1fc   : > { %2617 = vmatmul.bf16.gmra.mxu2 %v3154_v24  ;;  %v3497_v24 = vld [vmem:[#allocation3 + $0xd0] sm:$0xf0]  ;;  %v1328_v42 = vshrl.u32 %v1194_v1, 16  ;;  %v1331_v53 = vshll.u32 %v1194_v1, 16  ;;  %v3506_v37 = vld [vmem:[#allocation3 + $0x118] sm:$0xf0] }
 0x1fd   : > { %v3482_v39 = vld [vmem:[#allocation3 + $0x5c] sm:$0xf] }
 0x1fe   : > { %2483 = vmatmul.bf16.gmra.mxu3 %v3106_v11  ;;  %v1333_v61 = vrot.slane %v1331_v53, 7  ;;  %v2424_v53 = vadd.f32 %v4893_v21, %v4780_v9 }
 0x205   : > { %2683 = vmatmul.bf16.gmra.mxu0 %v3018_v51  ;;  %v3062_v51 = vor.u32 %v3497_v24, %v3061_v5  ;;  %v3097_v24 = vld [vmem:[#allocation3 + $0xf8] sm:$0xf] }
 0x206   : > { %2726 = vmatmul.bf16.gmra.mxu1 %v3022_v36  ;;  %v3514_v36 = vld [vmem:[#allocation3 + $0x158] sm:$0xf0]  ;;  %v3098_v5 = vor.u32 %v3506_v37, %v3097_v24 }
 0x207   : > { %v4837_v10 = vpop.f32.mrf.mxu2  ;;  %v3126_v57 = vor.u32 %v3514_v36, %v3125_v38  ;;  %v3519_v36 = vld [vmem:[#allocation3 + $0x184] sm:$0xf]  ;;  %v2422_v38 = vadd.f32 %v4893_v21, %v4757_v3 }
 0x20a   : > { %v4839_v56 = vpop.f32.mrf.mxu3 }
 0x20c   : > { %2622 = vmatmul.bf16.gmra.mxu2 %v1912_v19 }
 0x20d   : > { %v4841_v14 = vpop.f32.mrf.mxu0 }
 0x20e   : > { %2488 = vmatmul.bf16.gmra.mxu3 %v3142_v45 }
 0x20f   : > { %v4845_v4 = vpop.f32.mrf.mxu2 }
 0x212   : > { %v4843_v40 = vpop.f32.mrf.mxu1  ;;  %v4847_v58 = vpop.f32.mrf.mxu3 }
 0x215   : > { %2688 = vmatmul.bf16.gmra.mxu0 %v3054_v22  ;;  %v4849_v28 = vpop.f32.mrf.mxu0  ;;  %v1152_v22 = vrot.slane %v1150_v2, 4 }
 0x216   : > { %2731 = vmatmul.bf16.gmra.mxu1 %v3058_v33  ;;  %v3130_v33 = vor.u32 %v3510_v29, %v3127_v15  ;;  %v3163_v15 = vld [vmem:[#allocation3 + $0x1a4] sm:$0xf0] }
 0x217   : > { %v1154_v31 = vsel %vm3970_vm9, %v1152_v22, %v1153_v59  ;;  %v3166_v1 = vor.u32 %v3519_v36, %v3163_v15 }
 0x218   : > { %1180 = vst [vmem:[#allocation3 + $0x1c8] sm:$0xf] %v1154_v31 }
 0x21a   : > { %v4851_v54 = vpop.f32.mrf.mxu1 }
 0x21c   : > { %2769 = vmatmul.bf16.vlgmr.msra.gmra.mxu2 %v3026_v62  ;;  %v1326_v62 = vrot.slane %v4804_v48, 4  ;;  %v3011_v48 = vld [vmem:[#allocation3 + $0x7c] sm:$0xf0] }
 0x21d   : > { %v4853_v43 = vpop.f32.mrf.mxu2  ;;  %v3014_v25 = vor.u32 %v3482_v39, %v3011_v48 }
 0x21e   : > { %2493 = vmatmul.bf16.gmra.mxu3 %v1909_v49  ;;  %v4855_v55 = vpop.f32.mrf.mxu0  ;;  %v1330_v49 = vrot.slane %v1328_v42, 6  ;;  %v3515_v42 = vld [vmem:[#allocation3 + $0x160] sm:$0xf0] }
 0x21f   : > { %v4859_v8 = vpop.f32.mrf.mxu3 }
 0x220   : > { %v1334_v20 = vor.u32 %v1333_v61, %v1330_v49  ;;  %v3133_v61 = vld [vmem:[#allocation3 + $0x140] sm:$0xf] }
 0x222   : > { %v4857_v0 = vpop.f32.mrf.mxu1 }
 0x225   : > { %2693 = vmatmul.bf16.gmra.mxu0 %v3090_v46  ;;  %v4861_v27 = vpop.f32.mrf.mxu2  ;;  %v1335_v46 = vsel %vm3998_vm12, %v1326_v62, %v1334_v20  ;;  %v3047_v20 = vld [vmem:[#allocation3 + $0xc4] sm:$0xf0] }
 0x226   : > { %2736 = vmatmul.bf16.gmra.mxu1 %v3094_v16  ;;  %v4863_v44 = vpop.f32.mrf.mxu0  ;;  %1361 = vst [vmem:[#allocation3 + $0x1cc] sm:$0xf] %v1335_v46  ;;  %v3134_v46 = vor.u32 %v3515_v42, %v3133_v61 }
 0x227   : > { %v4867_v11 = vpop.f32.mrf.mxu3 }
 0x22a   : > { %v4865_v52 = vpop.f32.mrf.mxu1 }
 0x22c   : > { %2774 = vmatmul.bf16.gmra.mxu2 %v3062_v51  ;;  %v3161_v51 = vld [vmem:[#allocation3 + $0x180] sm:$0xf] }
 0x22d   : > { %v4869_v50 = vpop.f32.mrf.mxu2  ;;  %v4911_v3 = vld [vmem:[#allocation3 + $0x1c8] sm:$0xff] }
 0x22e   : > { %2635 = vmatmul.bf16.vlgmr.msra.gmra.mxu3 %v2978_v60  ;;  %v4871_v19 = vpop.f32.mrf.mxu0  ;;  %v3523_v60 = vld [vmem:[#allocation3 + $0x1a0] sm:$0xf0]  ;;  %v1851_v24 = vunpack.c.l.b16 %v4911_v3 }
 0x22f   : > { %v4875_v63 = vpop.f32.mrf.mxu3  ;;  %v3162_v6 = vor.u32 %v3523_v60, %v3161_v51 }
 0x230   : > { %v1914_v48 = vpack.c.b16 %v1851_v24, %v1851_v24  ;;  %v3479_v24 = vld [vmem:[#allocation3 + $0x40] sm:$0xf0] }
 0x232   : > { %v4873_v45 = vpop.f32.mrf.mxu1 }
 0x235   : > { %2698 = vmatmul.bf16.gmra.mxu0 %v3126_v57  ;;  %v4882_v30 = vpop.f32.mrf.mxu2 }
 0x236   : > { %2741 = vmatmul.bf16.gmra.mxu1 %v3130_v33  ;;  %v4884_v2 = vpop.f32.mrf.mxu0 }
 0x237   : > { %v2453_v16 = vpop.f32.mrf.mxu3 }
 0x238   : > { %v3491_v16 = vld [vmem:[#allocation3 + $0xa4] sm:$0xf] }
 0x23a   : > { %v4888_v23 = vpop.f32.mrf.mxu1 }
 0x23c   : > { %2779 = vmatmul.bf16.gmra.mxu2 %v3098_v5  ;;  %v3050_v5 = vor.u32 %v3491_v16, %v3047_v20  ;;  %v2989_v16 = vld [vmem:[#allocation3 + $0x20] sm:$0xf] }
 0x23d   : > { %v4895_v35 = vpop.f32.mrf.mxu2 }
 0x23e   : > { %2640 = vmatmul.bf16.gmra.mxu3 %v3014_v25  ;;  %v4899_v29 = vpop.f32.mrf.mxu0  ;;  %v2427_v25 = vadd.f32 %v4893_v21, %v4817_v41 }
 0x241   : > { %v2464_v22 = vpop.f32.mrf.mxu3 }
 0x242   : > { %v4901_v57 = vpop.f32.mrf.mxu1  ;;  %v4903_v33 = vadd.f32 %v2464_v22, %v2422_v38  ;;  %v3524_v22 = vld [vmem:[#allocation3 + $0x1a8] sm:$0xf0] }
 0x245   : > { %2703 = vmatmul.bf16.gmra.mxu0 %v3162_v6  ;;  %v4905_v59 = vpop.f32.mrf.mxu2  ;;  %v3169_v6 = vld [vmem:[#allocation3 + $0x188] sm:$0xf] }
 0x246   : > { %2746 = vmatmul.bf16.gmra.mxu1 %v3166_v1  ;;  %v4909_v31 = vpop.f32.mrf.mxu0  ;;  %v2429_v1 = vadd.f32 %v4893_v21, %v4828_v34  ;;  %v3170_v20 = vor.u32 %v3524_v22, %v3169_v6  ;;  %v2432_v34 = vadd.f32 %v4893_v21, %v4837_v10  ;;  %v3119_v10 = vld [vmem:[#allocation3 + $0x154] sm:$0xf0] }
 0x249   : > { %v2466_v49 = vpop.f32.mrf.mxu3 }
 0x24a   : > { %v4913_v62 = vpop.f32.mrf.mxu1  ;;  %v2467_v37 = vadd.f32 %v2466_v49, %v2424_v53  ;;  %v3083_v49 = vld [vmem:[#allocation3 + $0x10c] sm:$0xf0] }
 0x24c   : > { %v4917_v39 = vadd.f32 %v4833_v47, %v2467_v37  ;;  %2784 = vmatmul.bf16.gmra.mxu2 %v3134_v46  ;;  %v3500_v37 = vld [vmem:[#allocation3 + $0xec] sm:$0xf] }
 0x24e   : > { %2645 = vmatmul.bf16.gmra.mxu3 %v3050_v5 }
 0x24f   : > { %v4919_v9 = vpop.f32.mrf.mxu2 }
 0x251   : > { %v2469_v36 = vpop.f32.mrf.mxu3 }
 0x252   : > { %v4923_v51 = vpop.f32.mrf.mxu0  ;;  %v2470_v15 = vadd.f32 %v2469_v36, %v2427_v25  ;;  %v2990_v36 = vor.u32 %v3479_v24, %v2989_v16  ;;  %v3509_v24 = vld [vmem:[#allocation3 + $0x134] sm:$0xf] }
 0x253   : > { %v4925_v60 = vpop.f32.mrf.mxu1 }
 0x254   : > { %v4928_v38 = vadd.f32 %v4841_v14, %v2470_v15  ;;  %v3086_v14 = vor.u32 %v3500_v37, %v3083_v49  ;;  %v1430_v37 = vrot.slane %v1428_v18, 4  ;;  %v1852_v18 = vunpack.c.h.b16 %v4911_v3 }
 0x255   : > { %2708 = vmatmul.bf16.gmra.mxu0 %v1914_v48 }
 0x257   : > { %v4930_v47 = vpop.f32.mrf.mxu2 }
 0x259   : > { %v2471_v53 = vpop.f32.mrf.mxu3 }
 0x25a   : > { %v4934_v42 = vpop.f32.mrf.mxu0  ;;  %v2472_v61 = vadd.f32 %v2471_v53, %v2429_v1  ;;  %v2434_v1 = vadd.f32 %v4893_v21, %v4845_v4 }
 0x25b   : > { %v4936_v41 = vpop.f32.mrf.mxu1 }
 0x25c   : > { %v4939_v46 = vadd.f32 %v4849_v28, %v2472_v61  ;;  %2789 = vmatmul.bf16.gmra.mxu2 %v3170_v20  ;;  %v1375_v20 = vld [vmem:[#allocation2 + $0x3c] sm:$0x7] }
 0x25d   : > { %v1431_v16 = vrot.slane %v1375_v20, 7  ;;  %v2439_v20 = vadd.f32 %v4893_v21, %v4861_v27 }
 0x25e   : > { %2650 = vmatmul.bf16.gmra.mxu3 %v3086_v14 }
 0x25f   : > { %v4941_v5 = vpop.f32.mrf.mxu2 }
 0x261   : > { %v2474_v15 = vpop.f32.mrf.mxu3 }
 0x262   : > { %v4945_v48 = vpop.f32.mrf.mxu0  ;;  %v2475_v6 = vadd.f32 %v2474_v15, %v2432_v34  ;;  %v2437_v15 = vadd.f32 %v4893_v21, %v4853_v43 }
 0x263   : > { %v4947_v25 = vpop.f32.mrf.mxu1 }
 0x264   : > { %5310 = vst [vmem:[#allocation14_spill] sm:$0xff] %v4947_v25  ;;  %v4950_v28 = vadd.f32 %v4855_v55, %v2475_v6  ;;  %v3122_v55 = vor.u32 %v3509_v24, %v3119_v10  ;;  %v3518_v24 = vld [vmem:[#allocation3 + $0x17c] sm:$0xf] }
 0x265   : > { %2764 = vmatmul.bf16.vlgmr.msra.gmra.mxu0 %v2990_v36  ;;  %v1432_v36 = vsel %vm3948_vm6, %v1430_v37, %v1431_v16 }
 0x266   : > { %1458 = vst [vmem:[#allocation3 + $0x1d0] sm:$0xf] %v1432_v36 }
 0x267   : > { %v4952_v22 = vpop.f32.mrf.mxu2 }
 0x269   : > { %v2476_v61 = vpop.f32.mrf.mxu3 }
 0x26a   : > { %v2539_v53 = vpop.f32.mrf.mxu0  ;;  %v2477_v14 = vadd.f32 %v2476_v61, %v2434_v1 }
 0x26b   : > { %v2582_v49 = vpop.f32.mrf.mxu1  ;;  %v1915_v53 = vpack.c.b16 %v1852_v18, %v1852_v18 }
 0x26c   : > { %v4959_v34 = vadd.f32 %v4863_v44, %v2477_v14  ;;  %v3155_v14 = vld [vmem:[#allocation3 + $0x19c] sm:$0xf0] }
 0x26d   : > { %v1523_v49 = vld [vmem:[#allocation3 + $0x1d0] sm:$0xf]  ;;  %2751 = vmatmul.bf16.gmra.mxu1 %v1915_v53 }
 0x26e   : > { %2655 = vmatmul.bf16.gmra.mxu3 %v3122_v55  ;;  %v1853_v7 = vunpack.c.l.b16 %v1523_v49  ;;  %v3158_v55 = vor.u32 %v3518_v24, %v3155_v14  ;;  %v1850_v49 = vunpack.c.h.b16 %v4830_v17  ;;  %v2447_v17 = vadd.f32 %v4893_v21, %v4859_v8 }
 0x26f   : > { %v4963_v4 = vpop.f32.mrf.mxu2 }
 0x270   : > { %v1916_v10 = vpack.c.b16 %v1853_v7, %v1853_v7  ;;  %v2444_v7 = vadd.f32 %v4893_v21, %v4847_v58 }
 0x271   : > { %v2479_v26 = vpop.f32.mrf.mxu3 }
 0x272   : > { %v4967_v6 = vpop.f32.mrf.mxu0  ;;  %v2480_v1 = vadd.f32 %v2479_v26, %v2437_v15  ;;  %2794 = vmatmul.bf16.gmra.mxu2 %v1916_v10  ;;  %v2442_v15 = vadd.f32 %v4893_v21, %v4839_v56 }
 0x273   : > { %v4979_v16 = vpop.f32.mrf.mxu1 }
 0x274   : > { %v4971_v44 = vadd.f32 %v4871_v19, %v2480_v1 }
 0x277   : > { %v4973_v61 = vpop.f32.mrf.mxu2 }
 0x279   : > { %v2481_v37 = vpop.f32.mrf.mxu3 }
 0x27a   : > { %v4977_v43 = vpop.f32.mrf.mxu0  ;;  %v2482_v3 = vadd.f32 %v2481_v37, %v2439_v20  ;;  %v1913_v37 = vpack.c.b16 %v1850_v49, %v1850_v49 }
 0x27b   : > { %v4993_v53 = vpop.f32.mrf.mxu1 }
 0x27c   : > { %v4982_v19 = vadd.f32 %v4884_v2, %v2482_v3 }
 0x27e   : > { %2660 = vmatmul.bf16.gmra.mxu3 %v3158_v55 }
 0x27f   : > { %v4984_v36 = vpop.f32.mrf.mxu2 }
 0x281   : > { %v2484_v26 = vpop.f32.mrf.mxu3 }
 0x282   : > { %v4988_v27 = vpop.f32.mrf.mxu0  ;;  %v2485_v18 = vadd.f32 %v2484_v26, %v2442_v15 }
 0x284   : > { %v4991_v1 = vadd.f32 %v4899_v29, %v2485_v18  ;;  %v2727_v29 = vpop.f32.mrf.mxu1  ;;  %v2449_v18 = vadd.f32 %v4893_v21, %v4867_v11 }
 0x287   : > { %v4996_v2 = vpop.f32.mrf.mxu2 }
 0x288   : > { %5311 = vst [vmem:[#allocation16_spill] sm:$0xff] %v4996_v2 }
 0x289   : > { %v2486_v20 = vpop.f32.mrf.mxu3 }
 0x28a   : > { %v5000_v10 = vpop.f32.mrf.mxu0  ;;  %v2487_v56 = vadd.f32 %v2486_v20, %v2444_v7 }
 0x28c   : > { %v5003_v14 = vadd.f32 %v4909_v31, %v2487_v56  ;;  %v2729_v49 = vpop.f32.mrf.mxu1 }
 0x28e   : > { %2665 = vmatmul.bf16.gmra.mxu3 %v1913_v37  ;;  %v2452_v37 = vadd.f32 %v4893_v21, %v4875_v63 }
 0x28f   : > { %v5005_v3 = vpop.f32.mrf.mxu2 }
 0x290   : > { %5312 = vst [vmem:[#allocation24_spill] sm:$0xff] %v5005_v3  ;;  %v2508_v3 = vadd.f32 %v4824_v13, %v4903_v33 }
 0x291   : > { %v2489_v55 = vpop.f32.mrf.mxu3 }
 0x292   : > { %v5009_v24 = vpop.f32.mrf.mxu0  ;;  %v2490_v15 = vadd.f32 %v2489_v55, %v2447_v17 }
 0x294   : > { %v5012_v58 = vadd.f32 %v4923_v51, %v2490_v15  ;;  %v2732_v15 = vpop.f32.mrf.mxu1 }
 0x297   : > { %v2625_v26 = vpop.f32.mrf.mxu2 }
 0x299   : > { %v2491_v7 = vpop.f32.mrf.mxu3 }
 0x29a   : > { %v5016_v31 = vpop.f32.mrf.mxu0  ;;  %v2492_v20 = vadd.f32 %v2491_v7, %v2449_v18  ;;  %v2551_v7 = vadd.f32 %v4826_v32, %v2508_v3 }
 0x29c   : > { %v5019_v56 = vadd.f32 %v4934_v42, %v2492_v20  ;;  %v2734_v20 = vpop.f32.mrf.mxu1  ;;  %v2594_v21 = vadd.f32 %v4869_v50, %v2551_v7  ;;  %v2556_v50 = vadd.f32 %v4843_v40, %v4928_v38 }
 0x29f   : > { %v2770_v8 = vpop.f32.mrf.mxu2 }
 0x2a1   : > { %v2494_v51 = vpop.f32.mrf.mxu3 }
 0x2a2   : > { %v5023_v17 = vpop.f32.mrf.mxu0  ;;  %v2495_v55 = vadd.f32 %v2494_v51, %v2452_v37 }
 0x2a4   : > { %v5026_v26 = vadd.f32 %v4945_v48, %v2495_v55  ;;  %v2553_v55 = vadd.f32 %v4835_v12, %v4917_v39  ;;  %v5039_v13 = vpop.f32.mrf.mxu1  ;;  %v2599_v12 = vadd.f32 %v4895_v35, %v2556_v50 }
 0x2a6   : > { %5313 = vst [vmem:[#allocation20_spill] sm:$0xff] %v5026_v26  ;;  %v2596_v3 = vadd.f32 %v4882_v30, %v2553_v55 }
 0x2a7   : > { %v2772_v11 = vpop.f32.mrf.mxu2 }
 0x2a9   : > { %v2496_v42 = vpop.f32.mrf.mxu3 }
 0x2aa   : > { %v5030_v18 = vpop.f32.mrf.mxu0 }
 0x2ac   : > { %v5051_v39 = vpop.f32.mrf.mxu1 }
 0x2af   : > { %v2775_v25 = vpop.f32.mrf.mxu2 }
 0x2b1   : > { %v2636_v37 = vpop.f32.mrf.mxu3 }
 0x2b2   : > { %v5033_v63 = vpop.f32.mrf.mxu0  ;;  %v2637_v51 = vadd.f32 %v2636_v37, %v2594_v21 }
 0x2b4   : > { %v2680_v48 = vadd.f32 %v4967_v6, %v2637_v51 }
 0x2b7   : > { %v2777_v32 = vpop.f32.mrf.mxu2 }
 0x2b9   : > { %v2638_v42 = vpop.f32.mrf.mxu3 }
 0x2ba   : > { %v5041_v33 = vpop.f32.mrf.mxu0  ;;  %v2639_v26 = vadd.f32 %v2638_v42, %v2596_v3  ;;  %v2742_v3 = vpop.f32.mrf.mxu1 }
 0x2bc   : > { %v2682_v2 = vadd.f32 %v4977_v43, %v2639_v26  ;;  %v2558_v43 = vadd.f32 %v4851_v54, %v4939_v46  ;;  %v2561_v54 = vadd.f32 %v4857_v0, %v4950_v28 }
 0x2be   : > { %v2601_v38 = vadd.f32 %v4905_v59, %v2558_v43  ;;  %v2604_v59 = vadd.f32 %v4919_v9, %v2561_v54 }
 0x2bf   : > { %v2780_v21 = vpop.f32.mrf.mxu2 }
 0x2c1   : > { %v2641_v6 = vpop.f32.mrf.mxu3 }
 0x2c2   : > { %v5047_v7 = vpop.f32.mrf.mxu0  ;;  %v2642_v37 = vadd.f32 %v2641_v6, %v2599_v12 }
 0x2c4   : > { %v2685_v30 = vadd.f32 %v4988_v27, %v2642_v37  ;;  %v2563_v37 = vadd.f32 %v4865_v52, %v4959_v34  ;;  %v2723_v52 = vadd.f32 %v4979_v16, %v2680_v48  ;;  %v2725_v16 = vadd.f32 %v4993_v53, %v2682_v2 }
 0x2c6   : > { %v2728_v26 = vadd.f32 %v2727_v29, %v2685_v30  ;;  %v2744_v30 = vpop.f32.mrf.mxu1  ;;  %v2606_v28 = vadd.f32 %v4930_v47, %v2563_v37 }
 0x2c7   : > { %v2782_v42 = vpop.f32.mrf.mxu2 }
 0x2c8   : > { %v2771_v51 = vadd.f32 %v2770_v8, %v2728_v26 }
 0x2c9   : > { %v2643_v55 = vpop.f32.mrf.mxu3 }
 0x2ca   : > { %v5058_v40 = vpop.f32.mrf.mxu0  ;;  %2801 = vst [vmem:[%s5061_s30 + $0x10] sm:$0xff] %v2771_v51  ;;  %v2644_v35 = vadd.f32 %v2643_v55, %v2601_v38 }
 0x2cc   : > { %v2687_v27 = vadd.f32 %v5000_v10, %v2644_v35 }
 0x2ce   : > { %v2730_v46 = vadd.f32 %v2729_v49, %v2687_v27  ;;  %v2747_v38 = vpop.f32.mrf.mxu1 }
 0x2cf   : > { %v2785_v10 = vpop.f32.mrf.mxu2 }
 0x2d0   : > { %v2773_v29 = vadd.f32 %v2772_v11, %v2730_v46 }
 0x2d1   : > { %v2646_v50 = vpop.f32.mrf.mxu3 }
 0x2d2   : > { %v5067_v8 = vpop.f32.mrf.mxu0  ;;  %2802 = vst [vmem:[%s5061_s30 + $0x18] sm:$0xff] %v2773_v29  ;;  %v2647_v12 = vadd.f32 %v2646_v50, %v2604_v59 }
 0x2d4   : > { %v2690_v6 = vadd.f32 %v5009_v24, %v2647_v12  ;;  %v2566_v24 = vadd.f32 %v4873_v45, %v4971_v44  ;;  %v2568_v45 = vadd.f32 %v4888_v23, %v4982_v19  ;;  %v2571_v23 = vadd.f32 %v4901_v57, %v4991_v1 }
 0x2d6   : > { %v2733_v43 = vadd.f32 %v2732_v15, %v2690_v6  ;;  %v2609_v55 = vadd.f32 %v4941_v5, %v2566_v24  ;;  %v2611_v5 = vadd.f32 %v4952_v22, %v2568_v45  ;;  %v2749_v46 = vpop.f32.mrf.mxu1  ;;  %v2614_v2 = vadd.f32 %v4963_v4, %v2571_v23  ;;  %v5316_v24 = vld [vmem:[#allocation14_spill] sm:$0xff] }
 0x2d7   : > { %v2787_v34 = vpop.f32.mrf.mxu2 }
 0x2d8   : > { %v2776_v26 = vadd.f32 %v2775_v25, %v2733_v43  ;;  %v2576_v43 = vadd.f32 %v4925_v60, %v5012_v58 }
 0x2d9   : > { %v2648_v49 = vpop.f32.mrf.mxu3 }
 0x2da   : > { %v2711_v0 = vpop.f32.mrf.mxu0  ;;  %2803 = vst [vmem:[%s5061_s30 + $0x20] sm:$0xff] %v2776_v26  ;;  %v2649_v9 = vadd.f32 %v2648_v49, %v2606_v28  ;;  %v2619_v28 = vadd.f32 %v4984_v36, %v2576_v43 }
 0x2dc   : > { %v2692_v11 = vadd.f32 %v5016_v31, %v2649_v9  ;;  %v5314_v9 = vld [vmem:[#allocation16_spill] sm:$0xff] }
 0x2de   : > { %v2735_v51 = vadd.f32 %v2734_v20, %v2692_v11  ;;  %v5315_v11 = vld [vmem:[#allocation20_spill] sm:$0xff] }
 0x2df   : > { %v2790_v29 = vpop.f32.mrf.mxu2 }
 0x2e0   : > { %v2778_v15 = vadd.f32 %v2777_v32, %v2735_v51  ;;  %v2581_v51 = vadd.f32 %v5316_v24, %v5315_v11 }
 0x2e1   : > { %v2651_v47 = vpop.f32.mrf.mxu3 }
 0x2e2   : > { %v2765_v25 = vpop.f32.mrf.mxu0  ;;  %2804 = vst [vmem:[%s5061_s30 + $0x28] sm:$0xff] %v2778_v15  ;;  %v2652_v27 = vadd.f32 %v2651_v47, %v2609_v55 }
 0x2e3   : > { %v2766_v35 = vadd.f32 %v2765_v25, %v2723_v52 }
 0x2e4   : > { %v2695_v31 = vadd.f32 %v5023_v17, %v2652_v27 }
 0x2e5   : > { %2799 = vst [vmem:[%s5061_s30] sm:$0xff] %v2766_v35 }
 0x2e6   : > { %v2738_v44 = vadd.f32 %v5039_v13, %v2695_v31 }
 0x2e7   : > { %v2792_v50 = vpop.f32.mrf.mxu2 }
 0x2e8   : > { %v2781_v20 = vadd.f32 %v2780_v21, %v2738_v44 }
 0x2e9   : > { %v2653_v54 = vpop.f32.mrf.mxu3 }
 0x2ea   : > { %v2767_v48 = vpop.f32.mrf.mxu0  ;;  %2805 = vst [vmem:[%s5061_s30 + $0x30] sm:$0xff] %v2781_v20  ;;  %v2654_v59 = vadd.f32 %v2653_v54, %v2611_v5  ;;  %v2752_v21 = vpop.f32.mrf.mxu1 }
 0x2eb   : > { %v2768_v32 = vadd.f32 %v2767_v48, %v2725_v16 }
 0x2ec   : > { %v2697_v17 = vadd.f32 %v5030_v18, %v2654_v59  ;;  %v2573_v18 = vadd.f32 %v4913_v62, %v5003_v14 }
 0x2ed   : > { %2800 = vst [vmem:[%s5061_s30 + $0x8] sm:$0xff] %v2768_v32 }
 0x2ee   : > { %v2740_v19 = vadd.f32 %v5051_v39, %v2697_v17  ;;  %v2616_v57 = vadd.f32 %v4973_v61, %v2573_v18 }
 0x2f0   : > { %v2783_v53 = vadd.f32 %v2782_v42, %v2740_v19 }
 0x2f1   : > { %v2656_v13 = vpop.f32.mrf.mxu3 }
 0x2f2   : > { %2806 = vst [vmem:[%s5061_s30 + $0x38] sm:$0xff] %v2783_v53  ;;  %v2657_v22 = vadd.f32 %v2656_v13, %v2614_v2  ;;  %v2754_v42 = vpop.f32.mrf.mxu1 }
 0x2f4   : > { %v2700_v12 = vadd.f32 %v5033_v63, %v2657_v22 }
 0x2f5   : > { %v2795_v26 = vpop.f32.mrf.mxu2 }
 0x2f6   : > { %v2743_v6 = vadd.f32 %v2742_v3, %v2700_v12  ;;  %v2578_v3 = vadd.f32 %v4936_v41, %v5019_v56  ;;  %v5317_v41 = vld [vmem:[#allocation24_spill] sm:$0xff] }
 0x2f7   : > { %v2624_v56 = vadd.f32 %v5317_v41, %v2581_v51 }
 0x2f8   : > { %v2786_v37 = vadd.f32 %v2785_v10, %v2743_v6  ;;  %v2621_v60 = vadd.f32 %v5314_v9, %v2578_v3 }
 0x2f9   : > { %v2658_v1 = vpop.f32.mrf.mxu3 }
 0x2fa   : > { %2807 = vst [vmem:[%s5061_s30 + $0x40] sm:$0xff] %v2786_v37  ;;  %v2659_v39 = vadd.f32 %v2658_v1, %v2616_v57 }
 0x2fc   : > { %v2702_v4 = vadd.f32 %v5041_v33, %v2659_v39 }
 0x2fd   : > { %v2797_v33 = vpop.f32.mrf.mxu2 }
 0x2fe   : > { %v2745_v63 = vadd.f32 %v2744_v30, %v2702_v4 }
 0x300   : > { %v2788_v0 = vadd.f32 %v2787_v34, %v2745_v63 }
 0x301   : > { %v2661_v62 = vpop.f32.mrf.mxu3 }
 0x302   : > { %2808 = vst [vmem:[%s5061_s30 + $0x48] sm:$0xff] %v2788_v0  ;;  %v2662_v14 = vadd.f32 %v2661_v62, %v2619_v28 }
 0x304   : > { %v2705_v61 = vadd.f32 %v5047_v7, %v2662_v14 }
 0x306   : > { %v2748_v10 = vadd.f32 %v2747_v38, %v2705_v61 }
 0x308   : > { %v2791_v49 = vadd.f32 %v2790_v29, %v2748_v10 }
 0x309   : > { %v2663_v58 = vpop.f32.mrf.mxu3 }
 0x30a   : > { %2809 = vst [vmem:[%s5061_s30 + $0x50] sm:$0xff] %v2791_v49  ;;  %v2664_v30 = vadd.f32 %v2663_v58, %v2621_v60 }
 0x30c   : > { %v2707_v36 = vadd.f32 %v5058_v40, %v2664_v30 }
 0x30e   : > { %v2750_v52 = vadd.f32 %v2749_v46, %v2707_v36 }
 0x310   : > { %v2793_v7 = vadd.f32 %v2792_v50, %v2750_v52 }
 0x311   : > { %v2666_v38 = vpop.f32.mrf.mxu3 }
 0x312   : > { %2810 = vst [vmem:[%s5061_s30 + $0x58] sm:$0xff] %v2793_v7  ;;  %v2667_v34 = vadd.f32 %v2666_v38, %v2624_v56 }
 0x314   : > { %v2710_v40 = vadd.f32 %v5067_v8, %v2667_v34 }
 0x316   : > { %v2753_v15 = vadd.f32 %v2752_v21, %v2710_v40 }
 0x318   : > { %v2796_v25 = vadd.f32 %v2795_v26, %v2753_v15 }
 0x319   : > { %v2668_v55 = vpop.f32.mrf.mxu3 }
 0x31a   : > { %2811 = vst [vmem:[%s5061_s30 + $0x60] sm:$0xff] %v2796_v25 }
 0x31b   : > { %3765 = shalt.err (!%p3762_p8)
}
 0x31c   : > { %s3810_s25 = smov 128   ;;  %s3811_s26 = smov 8  }
 0x31d   : > { %3655 = dma.vmem_to_hbm [thread:$0]  (%p3880_p5), %s2826_s10, 1664, %s2828_s11, %s2813_s22, %s3810_s25, %s3810_s25, %s3811_s26  }
 0x31e PF: > { %p3667_p9 = scmp.ge.s32.totalorder %s3804_s21, 2  ;;  %s2842_s30 = sand.u32 1, %s3792_s18  }
 0x31f   : > { %s2843_s6 = scalar_lea.sflag [#allocation6], %s2842_s30 }
 0x320   : > { %p3662_p10 = pnand %p3667_p9, %p3884_p6 }
 0x322   : > { %p3663_p11 = pneg %p3662_p10 }
 0x324   : > { %3787 = dma.done.wait (%p3663_p11), %s2843_s6, 1664  }
 0x325   : > { %3789 = vsyncadd (%p3663_p11), %s2843_s6, 4294965632  ;;  %p16_p12 = scmp.ge.s32.totalorder %s3867_s24, 4   ;;  %s5318_s18 = smov %s3796_s19 }
 0x326   : > { %s5319_s19 = smov %s3800_s20  ;;  %s5320_s20 = smov %s3878_s27 }
 0x327   : > { %s5321_s21 = smov %s3867_s24  ;;  %18 = sbr.rel (!%p16_p12) target bundleno = 4 (0x4), region = 80 }
 0x32c   :  { %2849 = vsyncpa [#allocation5], 1 }
 0x32d   :  { %2851 = vsyncpa [#allocation5 + $0x1], 1 }
 0x32e   :  { %2852 = vsyncpa [#allocation6], 1 }
 0x32f   :  { %2854 = vsyncpa [#allocation6 + $0x1], 1 }

</bundles_post_ra>
